<compile_context>
chip_gen: v7x
topology: tpu7x:2x2x1
jax: 0.10.0
libtpu: 0.0.40
codegen_flags: <defaults>
</compile_context>

<pallas_src>
import jax
import jax.numpy as jnp
from jax import lax
from jax.experimental import pallas as pl
from jax.experimental.pallas import tpu as pltpu


# --------------------------------------------------------------------------
# Kernel
# --------------------------------------------------------------------------
def _residual_cnn_kernel(x_ref, w1_ref, w2_ref, vec_ref, o_ref):
    """One grid step = NB batch elements, flattened to rows.

    x_ref  : (R, L)       R = NB*C rows of the (N*C, L) input slab
    w1_ref : (R, K*R)     conv1 weights, batch-block-diag, tap-stacked,
                          with the BN2 scale pre-folded into the rows
    w2_ref : (R, K*R)     conv2 weights, batch-block-diag, tap-stacked
    vec_ref: (R, 8)       packed per-row vectors:
                          col 0 = BN1 scale, col 1 = BN1 shift,
                          col 2 = BN2 shift (+ conv1 bias, BN2-scaled),
                          col 3 = conv2 bias, cols 4..7 = padding
    o_ref  : (R, L)       output slab
    """
    R, L = x_ref.shape
    K = w1_ref.shape[1] // R
    p = K // 2

    x = x_ref[...].astype(jnp.float32)                       # (R, L)

    vec = vec_ref[...]                                        # (R, 8) f32
    s1 = vec[:, 0:1]
    sh1 = vec[:, 1:2]
    sh2 = vec[:, 2:3]
    b2 = vec[:, 3:4]

    # Column index, reused by both convs for the SAME-padding edge masks.
    col = lax.broadcasted_iota(jnp.int32, (R, L), 1)

    def conv(a, w_ref):
        # Build the K shifted copies with lane rotations (XLU) + edge masks;
        # no concatenate-padding, no unaligned lane slices.
        pieces = []
        for k in range(K):
            s = p - k                                   # shifted[l] = a[l - s]
            if s == 0:
                pieces.append(a)
            else:
                shifted = pltpu.roll(a, shift=s % L, axis=1)
                if s > 0:                               # left zero-padding
                    valid = col >= s
                else:                                   # right zero-padding
                    valid = col < (L + s)
                pieces.append(jnp.where(valid, shifted, 0.0))
        # Sublane-aligned stack (each piece is R rows, R % 8 == 0).
        stacked = jnp.concatenate(pieces, axis=0)             # (K*R, L)
        # Single fused MXU matmul covering all taps and all NB batch elements.
        # HIGHEST keeps true f32 numerics (DEFAULT may use bf16 passes).
        return jnp.dot(w_ref[...], stacked,
                       preferred_element_type=jnp.float32,
                       precision=lax.Precision.HIGHEST)       # (R, L) f32

    # block 1: BN1 -> ReLU -> (Dropout=identity) -> Conv1 (BN2 scale + conv1
    #          bias already folded into w1 / sh2 respectively)
    a1 = jnp.maximum(x * s1 + sh1, 0.0)
    y1 = conv(a1, w1_ref)

    # block 2: (BN2 scale folded) shift -> ReLU -> (Dropout=identity) -> Conv2
    a2 = jnp.maximum(y1 + sh2, 0.0)
    y2 = conv(a2, w2_ref)

    # conv2 bias + residual epilogue.
    o_ref[...] = (y2 + b2 + x).astype(o_ref.dtype)


# --------------------------------------------------------------------------
# Generation-aware block-batch choice
# --------------------------------------------------------------------------
def _num_tensorcores_per_chip():
    """Best-effort: v7x has 2 TensorCores per chip, v5e/v6e have 1."""
    try:
        kind = getattr(jax.devices()[0], "device_kind", "").lower()
        if "v7" in kind:
            return 2
    except Exception:
        pass
    return 1


def _pick_block_batch(N, C, *, num_cores=1, cap=8):
    """Pick NB (batch elements per grid step).

    - divides N, keeps R = NB*C sublane-aligned (or NB == N),
    - capped (block-diagonal weight grows as K*(NB*C)^2 and is mostly zeros),
    - single-TC chips: one grid step (grid is a serial loop, steps cost ~0.35us),
    - dual-TC chips (v7x): >= 2 steps per core so DMAs pipeline behind compute.
    """
    cands = [d for d in range(1, N + 1)
             if N % d == 0 and ((d * C) % 8 == 0 or d == N)]
    capped = [d for d in cands if d <= cap]
    cands = capped if capped else [min(cands)]
    if num_cores <= 1:
        return max(cands)
    want_steps = 2 * num_cores
    good = [d for d in cands if N // d >= want_steps]
    if good:
        return max(good)
    good = [d for d in cands if N // d >= num_cores]
    return max(good) if good else max(cands)


# --------------------------------------------------------------------------
# One-time parameter preparation (run at parameter-load time, not per call)
# --------------------------------------------------------------------------
def prepare_residual_cnn_params(params, block_batch, *, eps=1e-5):
    """Fold BN (eval mode), fold conv1 bias + BN2 scale, build blocked weights."""
    C, _, K = params["conv1_w"].shape
    assert K % 2 == 1, "ResidualCNN assumes odd kernel (SAME-length output)"
    NB = int(block_batch)
    R = NB * C

    def fold_bn(gamma, beta, mean, var):
        scale = gamma / jnp.sqrt(var + eps)
        shift = beta - mean * scale
        return scale, shift

    s1, sh1 = fold_bn(params["bn1_gamma"], params["bn1_beta"],
                      params["bn1_mean"], params["bn1_var"])
    s2, sh2 = fold_bn(params["bn2_gamma"], params["bn2_beta"],
                      params["bn2_mean"], params["bn2_var"])
    sh2 = sh2 + params["conv1_b"] * s2            # fold conv1 bias into BN2 shift

    def big_weight(w):
        # w: (Cout, Cin, K) PyTorch layout -> (NB*C, K*NB*C) batch-block-diag,
        # tap-major in columns. Wbig[b*C+co, k*NB*C + b'*C + ci] = d_bb' w[co,ci,k]
        taps = jnp.transpose(w, (2, 0, 1))        # (K, Cout, Cin)
        eye = jnp.eye(NB, dtype=w.dtype)
        return jnp.concatenate([jnp.kron(eye, taps[k]) for k in range(K)],
                               axis=1).astype(jnp.float32)

    def tile_col(v):                              # (C,) -> (NB*C, 1)
        return jnp.tile(v.reshape(C, 1), (NB, 1)).astype(jnp.float32)

    # Fold BN2 scale into the conv1 weight rows: W1' = diag(tile(s2)) @ W1_big.
    w1_big = big_weight(params["conv1_w"]) * tile_col(s2)
    w2_big = big_weight(params["conv2_w"])

    # Pack the four per-row vectors into one (R, 8) input (cols 4..7 zero).
    vec = jnp.zeros((R, 8), jnp.float32)
    vec = vec.at[:, 0:1].set(tile_col(s1))
    vec = vec.at[:, 1:2].set(tile_col(sh1))
    vec = vec.at[:, 2:3].set(tile_col(sh2))
    vec = vec.at[:, 3:4].set(tile_col(params["conv2_b"]))

    return {"w1_big": w1_big, "w2_big": w2_big, "vec": vec,
            "block_batch": NB, "channels": C}


# --------------------------------------------------------------------------
# Wrapper
# --------------------------------------------------------------------------
def residual_cnn_pallas(x, prep):
    """x: (N, C, L), f32 or bf16 (HBM I/O dtype; kernel math is f32).

    prep: output of prepare_residual_cnn_params.
    """
    N, C, L = x.shape
    NB = prep["block_batch"]
    assert C == prep["channels"]
    assert N % NB == 0, "batch must be divisible by the prepared block_batch"
    R = NB * C
    KR = prep["w1_big"].shape[1]     # K * NB * C
    K = KR // R
    assert K // 2 < L, "SAME-padding roll+mask assumes K//2 < L"

    # Free leading-dim merge (no transpose / no extra HBM traffic).
    x2 = x.reshape(N * C, L)
    grid = (N // NB,)

    const = lambda shape: pl.BlockSpec(shape, lambda n: (0, 0))

    out2 = pl.pallas_call(
        _residual_cnn_kernel,
        out_shape=jax.ShapeDtypeStruct((N * C, L), x.dtype),
        grid_spec=pltpu.PrefetchScalarGridSpec(
            num_scalar_prefetch=0,
            grid=grid,
            in_specs=[
                pl.BlockSpec((R, L), lambda n: (n, 0)),   # x rows (per step)
                const((R, KR)),                           # conv1 weights (resident)
                const((R, KR)),                           # conv2 weights (resident)
                const((R, 8)),                            # packed vectors (resident)
            ],
            out_specs=pl.BlockSpec((R, L), lambda n: (n, 0)),
        ),
        compiler_params=pltpu.CompilerParams(
            dimension_semantics=("parallel",)),
    )(x2, prep["w1_big"], prep["w2_big"], prep["vec"])
    return out2.reshape(N, C, L)


# --------------------------------------------------------------------------
# Pure-JAX reference (eval-mode PyTorch semantics)
# --------------------------------------------------------------------------
def residual_cnn_ref(x, params):
    eps = 1e-5

    def bn(v, g, b, m, var):
        return ((v - m[None, :, None]) / jnp.sqrt(var + eps)[None, :, None]
                * g[None, :, None] + b[None, :, None])

    def conv(v, w, b, pad):
        y = lax.conv_general_dilated(
            v, w, window_strides=(1,), padding=[(pad, pad)],
            dimension_numbers=("NCH", "OIH", "NCH"))
        return y + b[None, :, None]

    K = params["conv1_w"].shape[2]
    p = K // 2
    residual = x
    a = jax.nn.relu(bn(x, params["bn1_gamma"], params["bn1_beta"],
                       params["bn1_mean"], params["bn1_var"]))
    y = conv(a, params["conv1_w"], params["conv1_b"], p)
    a2 = jax.nn.relu(bn(y, params["bn2_gamma"], params["bn2_beta"],
                        params["bn2_mean"], params["bn2_var"]))
    y2 = conv(a2, params["conv2_w"], params["conv2_b"], p)
    return y2 + residual


if __name__ == "__main__":
    # Small shapes: batch=8, channels=8, seq length=128, kernel=3.
    # On v5e/v6e (1 TensorCore) the wrapper picks NB=8 -> ONE grid step of a
    # (64, 128) slab; on v7x (2 TensorCores) it picks NB=2 -> 4 'parallel'
    # steps so each core pipelines >= 2 iterations.
    N, C, L, K = 8, 8, 128, 3

    key = jax.random.PRNGKey(0)
    keys = jax.random.split(key, 13)
    params = {
        "conv1_w": 0.1 * jax.random.normal(keys[0], (C, C, K), jnp.float32),
        "conv1_b": 0.1 * jax.random.normal(keys[1], (C,), jnp.float32),
        "conv2_w": 0.1 * jax.random.normal(keys[2], (C, C, K), jnp.float32),
        "conv2_b": 0.1 * jax.random.normal(keys[3], (C,), jnp.float32),
        "bn1_gamma": 1.0 + 0.1 * jax.random.normal(keys[4], (C,), jnp.float32),
        "bn1_beta": 0.1 * jax.random.normal(keys[5], (C,), jnp.float32),
        "bn1_mean": 0.1 * jax.random.normal(keys[6], (C,), jnp.float32),
        "bn1_var": jnp.abs(jax.random.normal(keys[7], (C,), jnp.float32)) + 0.5,
        "bn2_gamma": 1.0 + 0.1 * jax.random.normal(keys[8], (C,), jnp.float32),
        "bn2_beta": 0.1 * jax.random.normal(keys[9], (C,), jnp.float32),
        "bn2_mean": 0.1 * jax.random.normal(keys[10], (C,), jnp.float32),
        "bn2_var": jnp.abs(jax.random.normal(keys[11], (C,), jnp.float32)) + 0.5,
    }
    x = jax.random.normal(keys[12], (N, C, L), jnp.float32)

    # One-time prep (would normally happen at parameter-load time).
    NB = _pick_block_batch(N, C, num_cores=_num_tensorcores_per_chip())
    prep = prepare_residual_cnn_params(params, NB)

    ref = jax.block_until_ready(residual_cnn_ref(x, params))

    # f32 HBM I/O path: tight parity with the PyTorch (eval-mode) reference.
    out = jax.block_until_ready(residual_cnn_pallas(x, prep))
    assert out.shape == (N, C, L)
    err = float(jnp.max(jnp.abs(out - ref)))
    assert jnp.allclose(out, ref, atol=1e-4, rtol=1e-4), err

    # Optional bf16 HBM I/O path (halves activation traffic; f32 math inside).
    out_bf = jax.block_until_ready(
        residual_cnn_pallas(x.astype(jnp.bfloat16), prep))
    assert out_bf.dtype == jnp.bfloat16
    err_bf = float(jnp.max(jnp.abs(out_bf.astype(jnp.float32) - ref)))
    assert err_bf < 0.1, err_bf

    print("KERNEL_OK")
</pallas_src>

<mosaic_0001>
module attributes {stable_mosaic.version = 11 : i64} {
  func.func @_residual_cnn_kernel(%arg0: i32, %arg1: memref<64x128xf32, #tpu.memory_space<vmem>>, %arg2: memref<64x192xf32, #tpu.memory_space<vmem>>, %arg3: memref<64x192xf32, #tpu.memory_space<vmem>>, %arg4: memref<64x8xf32, #tpu.memory_space<vmem>>, %arg5: memref<64x128xf32, #tpu.memory_space<vmem>>) attributes {dimension_semantics = [#tpu.dimension_semantics<parallel>], iteration_bounds = array<i64: 1>, scalar_prefetch = 0 : i64, scratch_operands = 0 : i64, tpu.core_type = #tpu.core_type<tc>, window_params = [{transform_indices = @transform_0, window_bounds = array<i64: 64, 128>}, {pipeline_mode = #tpu.pipeline_mode<synchronous>, transform_indices = @transform_1, window_bounds = array<i64: 64, 192>}, {pipeline_mode = #tpu.pipeline_mode<synchronous>, transform_indices = @transform_2, window_bounds = array<i64: 64, 192>}, {pipeline_mode = #tpu.pipeline_mode<synchronous>, transform_indices = @transform_3, window_bounds = array<i64: 64, 8>}, {transform_indices = @transform_4, window_bounds = array<i64: 64, 128>}]} {
    %c0 = arith.constant 0 : index
    %c0_0 = arith.constant 0 : index
    %0 = vector.load %arg1[%c0, %c0_0] : memref<64x128xf32, #tpu.memory_space<vmem>>, vector<64x128xf32>
    %c0_1 = arith.constant 0 : index
    %c0_2 = arith.constant 0 : index
    %1 = vector.load %arg4[%c0_1, %c0_2] : memref<64x8xf32, #tpu.memory_space<vmem>>, vector<64x8xf32>
    %2 = vector.extract_strided_slice %1 {offsets = [0, 0], sizes = [64, 1], strides = [1, 1]} : vector<64x8xf32> to vector<64x1xf32>
    %3 = vector.extract_strided_slice %1 {offsets = [0, 1], sizes = [64, 1], strides = [1, 1]} : vector<64x8xf32> to vector<64x1xf32>
    %4 = vector.extract_strided_slice %1 {offsets = [0, 2], sizes = [64, 1], strides = [1, 1]} : vector<64x8xf32> to vector<64x1xf32>
    %5 = vector.extract_strided_slice %1 {offsets = [0, 3], sizes = [64, 1], strides = [1, 1]} : vector<64x8xf32> to vector<64x1xf32>
    %6 = tpu.iota {dimensions = array<i32: 1>} : vector<64x128xi32>
    %7 = vector.broadcast %2 : vector<64x1xf32> to vector<64x128xf32>
    %8 = arith.mulf %0, %7 : vector<64x128xf32>
    %9 = vector.broadcast %3 : vector<64x1xf32> to vector<64x128xf32>
    %10 = arith.addf %8, %9 : vector<64x128xf32>
    %cst = arith.constant 0.000000e+00 : f32
    %11 = vector.broadcast %cst : f32 to vector<64x128xf32>
    %12 = arith.maximumf %10, %11 : vector<64x128xf32>
    %c1_i32 = arith.constant 1 : i32
    %13 = tpu.dynamic_rotate %12 by %c1_i32 dim 1 : vector<64x128xf32>, i32 -> vector<64x128xf32>
    %c1_i32_3 = arith.constant 1 : i32
    %14 = vector.broadcast %c1_i32_3 : i32 to vector<64x128xi32>
    %15 = arith.cmpi sge, %6, %14 : vector<64x128xi32>
    %cst_4 = arith.constant 0.000000e+00 : f32
    %16 = vector.broadcast %cst_4 : f32 to vector<64x128xf32>
    %17 = arith.select %15, %13, %16 : vector<64x128xi1>, vector<64x128xf32>
    %c127_i32 = arith.constant 127 : i32
    %18 = tpu.dynamic_rotate %12 by %c127_i32 dim 1 : vector<64x128xf32>, i32 -> vector<64x128xf32>
    %c127_i32_5 = arith.constant 127 : i32
    %19 = vector.broadcast %c127_i32_5 : i32 to vector<64x128xi32>
    %20 = arith.cmpi slt, %6, %19 : vector<64x128xi32>
    %cst_6 = arith.constant 0.000000e+00 : f32
    %21 = vector.broadcast %cst_6 : f32 to vector<64x128xf32>
    %22 = arith.select %20, %18, %21 : vector<64x128xi1>, vector<64x128xf32>
    %23 = tpu.concatenate %17, %12, %22 in 0 : vector<64x128xf32>, vector<64x128xf32>, vector<64x128xf32> -> vector<192x128xf32>
    %c0_7 = arith.constant 0 : index
    %c0_8 = arith.constant 0 : index
    %24 = vector.load %arg2[%c0_7, %c0_8] : memref<64x192xf32, #tpu.memory_space<vmem>>, vector<64x192xf32>
    %cst_9 = arith.constant dense<0.000000e+00> : vector<64x128xf32>
    %25 = tpu.matmul %24, %23, %cst_9 {dimension_numbers = #tpu.dot_dimension_numbers<[1], [0], [0], [1], [0, 0, 1, 1], [], []>, precision = #tpu.contract_precision<fp32>} : vector<64x192xf32>, vector<192x128xf32>, vector<64x128xf32> -> vector<64x128xf32>
    %26 = vector.broadcast %4 : vector<64x1xf32> to vector<64x128xf32>
    %27 = arith.addf %25, %26 : vector<64x128xf32>
    %cst_10 = arith.constant 0.000000e+00 : f32
    %28 = vector.broadcast %cst_10 : f32 to vector<64x128xf32>
    %29 = arith.maximumf %27, %28 : vector<64x128xf32>
    %c1_i32_11 = arith.constant 1 : i32
    %30 = tpu.dynamic_rotate %29 by %c1_i32_11 dim 1 : vector<64x128xf32>, i32 -> vector<64x128xf32>
    %c1_i32_12 = arith.constant 1 : i32
    %31 = vector.broadcast %c1_i32_12 : i32 to vector<64x128xi32>
    %32 = arith.cmpi sge, %6, %31 : vector<64x128xi32>
    %cst_13 = arith.constant 0.000000e+00 : f32
    %33 = vector.broadcast %cst_13 : f32 to vector<64x128xf32>
    %34 = arith.select %32, %30, %33 : vector<64x128xi1>, vector<64x128xf32>
    %c127_i32_14 = arith.constant 127 : i32
    %35 = tpu.dynamic_rotate %29 by %c127_i32_14 dim 1 : vector<64x128xf32>, i32 -> vector<64x128xf32>
    %c127_i32_15 = arith.constant 127 : i32
    %36 = vector.broadcast %c127_i32_15 : i32 to vector<64x128xi32>
    %37 = arith.cmpi slt, %6, %36 : vector<64x128xi32>
    %cst_16 = arith.constant 0.000000e+00 : f32
    %38 = vector.broadcast %cst_16 : f32 to vector<64x128xf32>
    %39 = arith.select %37, %35, %38 : vector<64x128xi1>, vector<64x128xf32>
    %40 = tpu.concatenate %34, %29, %39 in 0 : vector<64x128xf32>, vector<64x128xf32>, vector<64x128xf32> -> vector<192x128xf32>
    %c0_17 = arith.constant 0 : index
    %c0_18 = arith.constant 0 : index
    %41 = vector.load %arg3[%c0_17, %c0_18] : memref<64x192xf32, #tpu.memory_space<vmem>>, vector<64x192xf32>
    %cst_19 = arith.constant dense<0.000000e+00> : vector<64x128xf32>
    %42 = tpu.matmul %41, %40, %cst_19 {dimension_numbers = #tpu.dot_dimension_numbers<[1], [0], [0], [1], [0, 0, 1, 1], [], []>, precision = #tpu.contract_precision<fp32>} : vector<64x192xf32>, vector<192x128xf32>, vector<64x128xf32> -> vector<64x128xf32>
    %43 = vector.broadcast %5 : vector<64x1xf32> to vector<64x128xf32>
    %44 = arith.addf %42, %43 : vector<64x128xf32>
    %45 = arith.addf %44, %0 : vector<64x128xf32>
    %c0_20 = arith.constant 0 : index
    %c0_21 = arith.constant 0 : index
    %46 = vector.load %arg5[%c0_20, %c0_21] : memref<64x128xf32, #tpu.memory_space<vmem>>, vector<64x128xf32>
    tpu.vector_store %arg5[%c0_20, %c0_21], %45 {strides = array<i32>} : memref<64x128xf32, #tpu.memory_space<vmem>>, vector<64x128xf32>,
    return
  }
  func.func @transform_0(%arg0: i32) -> (i32, i32) {
    %c0_i32 = arith.constant 0 : i32
    %c0_i32_0 = arith.constant 0 : i32
    return %arg0, %c0_i32 : i32, i32
  }
  func.func @transform_1(%arg0: i32) -> (i32, i32) {
    %c0_i32 = arith.constant 0 : i32
    %c0_i32_0 = arith.constant 0 : i32
    %c0_i32_1 = arith.constant 0 : i32
    return %c0_i32, %c0_i32_0 : i32, i32
  }
  func.func @transform_2(%arg0: i32) -> (i32, i32) {
    %c0_i32 = arith.constant 0 : i32
    %c0_i32_0 = arith.constant 0 : i32
    %c0_i32_1 = arith.constant 0 : i32
    return %c0_i32, %c0_i32_0 : i32, i32
  }
  func.func @transform_3(%arg0: i32) -> (i32, i32) {
    %c0_i32 = arith.constant 0 : i32
    %c0_i32_0 = arith.constant 0 : i32
    %c0_i32_1 = arith.constant 0 : i32
    return %c0_i32, %c0_i32_0 : i32, i32
  }
  func.func @transform_4(%arg0: i32) -> (i32, i32) {
    %c0_i32 = arith.constant 0 : i32
    %c0_i32_0 = arith.constant 0 : i32
    return %arg0, %c0_i32 : i32, i32
  }
}

</mosaic_0001>

<bundles_post_ra>
// kernel: tpu_custom_call.1
= control target key start
LH: loop header
LB: loop body
LE: loop exit
PB: predicated region body
PF: predicated region fallthrough
CT: control target
= control target key end

     0   :  { %9 = vsyncpa [#allocation3], 0  ;;  %s5065_s0 = inlined_call_operand.vmem [shape: f32[64,128], index: 0, kind: input, shape index: {}]   ;;  %s5066_s1 = inlined_call_operand.hbm [shape: f32[64,192], index: 1, kind: input, shape index: {}]   ;;  %s5067_s2 = inlined_call_operand.hbm [shape: f32[64,192], index: 2, kind: input, shape index: {}]   ;;  %s5068_s3 = inlined_call_operand.vmem [shape: f32[64,8], index: 3, kind: input, shape index: {}]   ;;  %s5069_s4 = inlined_call_operand.hbm [shape: f32[64,128], index: 4, kind: output, shape index: {}]  }
   0x1   :  { %10 = vsyncpa [#allocation6], 0 }
   0x2   :  { %11 = vsyncpa [#allocation4], 0  ;;  %s3382_s15 = smov [#allocation2]   ;;  %s3310_s19 = scalar_lea.hbm %s5066_s1, 2048 }
   0x3   :  { %s19_s16 = sshll.u32 %s3382_s15, 4  ;;  %p3311_p0 = scmp.ne.s32.totalorder %s5066_s1, %s3310_s19  ;;  %s20_s16 = int_to_ptr.vmem [resolvable:$true] %s19_s16 }
   0x4   :  { %p3314_p1 = scmp.lt.u32.totalorder %s3310_s19, %s5066_s1 }
   0x6   :  { %p3316_p2 = pnand %p3314_p1, %p3311_p0 }
   0x8   :  { %3319 = shalt.err (!%p3316_p2)
}
   0x9   :  { %s3320_s24 = scalar_lea.vmem %s20_s16, 2048  ;;  %p3325_p4 = scmp.lt.s32.totalorder %s20_s16, %s20_s16 }
   0xa   :  { %p3321_p3 = scmp.ne.s32.totalorder %s20_s16, %s3320_s24  ;;  %p3326_p5 = scmp.lt.s32.totalorder %s3320_s24, %s3320_s24 }
   0xc   :  { %p3327_p6 = por %p3326_p5, %p3325_p4 }
   0xe   :  { %p3328_p7 = pnand %p3327_p6, %p3321_p3 }
  0x10   :  { %3331 = shalt.err (!%p3328_p7)
}
  0x11   :  { %s3383_s25 = smov 256   ;;  %s3384_s26 = smov 16  }
  0x12   :  { %25 = dma.hbm_to_vmem [thread:$0]  %s5066_s1, 2048, %s20_s16, [#allocation3], %s3383_s25, %s3383_s25, %s3384_s26  }
  0x13   :  { %s3385_s29 = smov [#allocation5]   ;;  %s3332_s7 = scalar_lea.hbm %s5067_s2, 2048 }
  0x14   :  { %s31_s30 = sshll.u32 %s3385_s29, 4  ;;  %p3333_p8 = scmp.ne.s32.totalorder %s5067_s2, %s3332_s7  ;;  %s32_s30 = int_to_ptr.vmem [resolvable:$true] %s31_s30 }
  0x15   :  { %p3336_p9 = scmp.lt.u32.totalorder %s3332_s7, %s5067_s2 }
  0x17   :  { %p3338_p10 = pnand %p3336_p9, %p3333_p8 }
  0x19   :  { %3341 = shalt.err (!%p3338_p10)
}
  0x1a   :  { %s3342_s12 = scalar_lea.vmem %s32_s30, 2048  ;;  %p3347_p12 = scmp.lt.s32.totalorder %s32_s30, %s32_s30 }
  0x1b   :  { %p3343_p11 = scmp.ne.s32.totalorder %s32_s30, %s3342_s12  ;;  %p3348_p13 = scmp.lt.s32.totalorder %s3342_s12, %s3342_s12 }
  0x1d   :  { %p3349_p0 = por %p3348_p13, %p3347_p12 }
  0x1f   :  { %p3350_p1 = pnand %p3349_p0, %p3343_p11 }
  0x21   :  { %3353 = shalt.err (!%p3350_p1)
}
  0x22   :  { %37 = dma.hbm_to_vmem [thread:$0]  %s5067_s2, 2048, %s32_s30, [#allocation6], %s3383_s25, %s3383_s25, %s3384_s26  }
  0x23   :  { %3376 = dma.done.wait [#allocation3], 2048  }
  0x24   :  { %3377 = vsyncadd [#allocation3], 4294965248 }
  0x25   :  { %3378 = dma.done.wait [#allocation6], 2048  }
  0x26   :  { %3379 = vsyncadd [#allocation6], 4294965248  ;;  %v3386_v0 = vmov 1   ;;  %v3387_v1 = vmov 0   ;;  %v54_v2 = vld [vmem:[%s5068_s3] sm:$0xff]  ;;  %v55_v3 = vld [vmem:[%s5068_s3 + $0x8] sm:$0xff] }
  0x27   :  { %3280 = vset.pattern.permute.xlu1 %v3386_v0  ;;  %3279 = vset.pattern.permute.xlu0 %v3387_v1  ;;  %v56_v4 = vld [vmem:[%s5068_s3 + $0x10] sm:$0xff]  ;;  %v57_v5 = vld [vmem:[%s5068_s3 + $0x18] sm:$0xff]  ;;  %v59_v6 = vld [vmem:[%s5068_s3 + $0x28] sm:$0xff]  ;;  %s3388_s5 = smov 1   ;;  %v5084_v19 = vmov 0.0|0.0   ;;  %s3390_s2 = smov 127  }
  0x28   :  { %113 = vperm.xlu1 %3280, %v54_v2   ;;  %66 = vperm.xlu0 %3279, %v54_v2   ;;  %v58_v7 = vld [vmem:[%s5068_s3 + $0x20] sm:$0xff]  ;;  %v60_v8 = vld [vmem:[%s5068_s3 + $0x30] sm:$0xff]  ;;  %v61_v9 = vld [vmem:[%s5068_s3 + $0x38] sm:$0xff]  ;;  %vm258_vm0 = vcmask 523264   ;;  %s3393_s20 = smov [#allocation7]  }
  0x29   :  { %v46_v10 = vld [vmem:[%s5065_s0] sm:$0xff]  ;;  %v47_v18 = vld [vmem:[%s5065_s0 + $0x8] sm:$0xff]  ;;  %2745 = vmatprep.subr.bf16.mxu0 %v5084_v19  ;;  %2961 = vmatprep.subr.bf16.mxu1 %v5084_v19  ;;  %v49_v21 = vld [vmem:[%s5065_s0 + $0x18] sm:$0xff]  ;;  %s2732_s21 = sshll.u32 %s3393_s20, 4  ;;  %s2733_s21 = int_to_ptr.vmem [resolvable:$true] %s2732_s21 }
  0x2a   :  { %v48_v25 = vld [vmem:[%s5065_s0 + $0x10] sm:$0xff]  ;;  %v50_v43 = vld [vmem:[%s5065_s0 + $0x20] sm:$0xff]  ;;  %v51_v55 = vld [vmem:[%s5065_s0 + $0x28] sm:$0xff]  ;;  %s3354_s24 = scalar_lea.vmem %s2733_s21, 1024  ;;  %p3359_p3 = scmp.lt.s32.totalorder %s2733_s21, %s2733_s21 }
  0x2b   :  { %v52_v52 = vld [vmem:[%s5065_s0 + $0x30] sm:$0xff]  ;;  %p3355_p2 = scmp.ne.s32.totalorder %s2733_s21, %s3354_s24  ;;  %p3360_p4 = scmp.lt.s32.totalorder %s3354_s24, %s3354_s24 }
  0x2c   :  { %117 = vperm.xlu1 %3280, %v55_v3   ;;  %3282 = vset.pattern.permute.xlu0 %v3386_v0 }
  0x2d   :  { %121 = vperm.xlu0 %3282, %v56_v4   ;;  %p3361_p5 = por %p3360_p4, %p3359_p3 }
  0x2f   :  { %p3362_p6 = pnand %p3361_p5, %p3355_p2 }
  0x30   :  { %3281 = vset.pattern.permute.xlu1 %v3387_v1 }
  0x31   :  { %81 = vperm.xlu1 %3281, %v57_v5   ;;  %3283 = vset.pattern.permute.xlu0 %v3387_v1 }
  0x32   :  { %71 = vperm.xlu0 %3283, %v55_v3  }
  0x35   :  { %3284 = vset.pattern.permute.xlu1 %v3386_v0 }
  0x36   :  { %125 = vperm.xlu1 %3284, %v57_v5   ;;  %76 = vperm.xlu0 %3283, %v56_v4  }
  0x3a   :  { %3285 = vset.pattern.permute.xlu1 %v3387_v1  ;;  %91 = vperm.xlu0 %3283, %v59_v6  }
  0x3b   :  { %86 = vperm.xlu1 %3285, %v58_v7  }
  0x3e   :  { %96 = vperm.xlu0 %3283, %v60_v8  }
  0x3f   :  { %3286 = vset.pattern.permute.xlu1 %v3386_v0 }
  0x40   :  { %129 = vperm.xlu1 %3286, %v58_v7  }
  0x42   :  { %3288 = vset.pattern.permute.xlu0 %v3386_v0 }
  0x43   :  { %137 = vperm.xlu0 %3288, %v60_v8  }
  0x44   :  { %133 = vperm.xlu1 %3286, %v59_v6  }
  0x48   :  { %3287 = vset.pattern.permute.xlu1 %v3387_v1 }
  0x49   :  { %101 = vperm.xlu1 %3287, %v61_v9  }
  0x4d   :  { %3289 = vset.pattern.permute.xlu1 %v3386_v0 }
  0x4e   :  { %141 = vperm.xlu1 %3289, %v61_v9  }
  0xa7   :  { %v114_v11 = vpop.permute.xlu1 %113  ;;  %v67_v12 = vpop.permute.xlu0 %66 }
  0xa8   :  { %v104_v13 = vmul.f32 %v67_v12, %v46_v10 }
  0xaa   :  { %v144_v14 = vadd.f32 %v114_v11, %v104_v13 }
  0xab   :  { %v118_v15 = vpop.permute.xlu1 %117 }
  0xac   :  { %v3472_v16 = vmax.f32 %v144_v14, 0.0  ;;  %v122_v17 = vpop.permute.xlu0 %121 }
  0xae   :  { %160 = vrot.lane.b32.xlu1 %v3472_v16, %s3388_s5  ;;  %v308_v23 = vand.u32 4294901760, %v3472_v16 }
  0xb0   :  { %v82_v20 = vpop.permute.xlu1 %81  ;;  %v3489_v30 = vsub.f32 %v3472_v16, %v308_v23 }
  0xb1   :  { %v72_v22 = vpop.permute.xlu0 %71  ;;  %v107_v26 = vmul.f32 %v82_v20, %v49_v21 }
  0xb2   :  { %v105_v24 = vmul.f32 %v72_v22, %v47_v18  ;;  %v551_v38 = vand.u32 4294901760, %v3489_v30 }
  0xb4   :  { %v145_v27 = vadd.f32 %v118_v15, %v105_v24  ;;  %v552_v50 = vsub.f32 %v3489_v30, %v551_v38  ;;  %v53_v24 = vld [vmem:[%s5065_s0 + $0x38] sm:$0xff] }
  0xb5   :  { %v126_v28 = vpop.permute.xlu1 %125  ;;  %v77_v29 = vpop.permute.xlu0 %76 }
  0xb6   :  { %v3491_v31 = vmax.f32 %v145_v27, 0.0  ;;  %v147_v32 = vadd.f32 %v126_v28, %v107_v26  ;;  %v106_v33 = vmul.f32 %v77_v29, %v48_v25  ;;  %v553_v0 = vand.u32 4294901760, %v552_v50 }
  0xb8   :  { %v3493_v34 = vmax.f32 %v147_v32, 0.0  ;;  %v146_v35 = vadd.f32 %v122_v17, %v106_v33  ;;  %162 = vrot.lane.b32.xlu0 %v3491_v31, %s3388_s5  ;;  %v311_v36 = vand.u32 4294901760, %v3491_v31 }
  0xb9   :  { %v92_v37 = vpop.permute.xlu0 %91 }
  0xba   :  { %v3499_v39 = vmax.f32 %v146_v35, 0.0  ;;  %v87_v40 = vpop.permute.xlu1 %86  ;;  %v3501_v41 = vpack.c.bf16 %v311_v36, %v308_v23  ;;  %v3504_v42 = vsub.f32 %v3491_v31, %v311_v36  ;;  %v317_v44 = vand.u32 4294901760, %v3493_v34 }
  0xbb   :  { %v108_v51 = vmul.f32 %v87_v40, %v50_v43  ;;  %v109_v3 = vmul.f32 %v92_v37, %v51_v55 }
  0xbc   :  { %5207 = vst [vmem:[#allocation11_spill] sm:$0xff] %v3501_v41  ;;  %166 = vrot.lane.b32.xlu0 %v3493_v34, %s3388_s5  ;;  %164 = vrot.lane.b32.xlu1 %v3499_v39, %s3388_s5  ;;  %v314_v45 = vand.u32 4294901760, %v3499_v39  ;;  %v558_v46 = vand.u32 4294901760, %v3504_v42  ;;  %v3519_v49 = vsub.f32 %v3493_v34, %v317_v44 }
  0xbd   :  { %v97_v48 = vpop.permute.xlu0 %96 }
  0xbe   :  { %5208 = vst [vmem:[#allocation12_spill] sm:$0xff] %v3519_v49  ;;  %v3525_v53 = vpack.c.bf16 %v317_v44, %v314_v45  ;;  %v3528_v54 = vsub.f32 %v3499_v39, %v314_v45  ;;  %v559_v57 = vsub.f32 %v3504_v42, %v558_v46  ;;  %v572_v58 = vand.u32 4294901760, %v3519_v49 }
  0xbf   :  { %v130_v56 = vpop.permute.xlu1 %129  ;;  %v3535_v59 = vpack.c.bf16 %v558_v46, %v551_v38  ;;  %v110_v63 = vmul.f32 %v97_v48, %v52_v52 }
  0xc0   :  { %5209 = vst [vmem:[#allocation13_spill] sm:$0xff] %v3525_v53  ;;  %5210 = vst [vmem:[#allocation14_spill] sm:$0xff] %v3528_v54  ;;  %v148_v60 = vadd.f32 %v130_v56, %v108_v51  ;;  %v565_v61 = vand.u32 4294901760, %v3528_v54  ;;  %v560_v1 = vand.u32 4294901760, %v559_v57  ;;  %v573_v2 = vsub.f32 %v3519_v49, %v572_v58 }
  0xc1   :  { %5211 = vst [vmem:[#allocation15_spill] sm:$0xff] %v3535_v59 }
  0xc2   :  { %v156_v4 = vmax.f32 %v148_v60, 0.0  ;;  %v138_v5 = vpop.permute.xlu0 %137  ;;  %v566_v6 = vsub.f32 %v3528_v54, %v565_v61  ;;  %v3542_v7 = vpack.c.bf16 %v572_v58, %v565_v61  ;;  %v3544_v10 = vpack.c.bf16 %v560_v1, %v553_v0 }
  0xc3   :  { %v150_v8 = vadd.f32 %v138_v5, %v110_v63  ;;  %v134_v9 = vpop.permute.xlu1 %133  ;;  %v574_v14 = vand.u32 4294901760, %v573_v2 }
  0xc4   :  { %5212 = vst [vmem:[#allocation16_spill] sm:$0xff] %v3542_v7  ;;  %v149_v11 = vadd.f32 %v134_v9, %v109_v3  ;;  %168 = vrot.lane.b32.xlu1 %v156_v4, %s3388_s5  ;;  %v320_v12 = vand.u32 4294901760, %v156_v4  ;;  %v567_v13 = vand.u32 4294901760, %v566_v6 }
  0xc5   :  { %v158_v15 = vmax.f32 %v150_v8, 0.0 }
  0xc6   :  { %v157_v17 = vmax.f32 %v149_v11, 0.0  ;;  %v3547_v18 = vsub.f32 %v156_v4, %v320_v12  ;;  %v3549_v20 = vpack.c.bf16 %v574_v14, %v567_v13 }
  0xc7   :  { %v326_v27 = vand.u32 4294901760, %v158_v15 }
  0xc8   :  { %5213 = vst [vmem:[#allocation17_spill] sm:$0xff] %v3547_v18  ;;  %v102_v21 = vpop.permute.xlu1 %101  ;;  %170 = vrot.lane.b32.xlu0 %v157_v17, %s3388_s5  ;;  %172 = vrot.lane.b32.xlu1 %v158_v15, %s3388_s5  ;;  %v323_v22 = vand.u32 4294901760, %v157_v17  ;;  %v579_v23 = vand.u32 4294901760, %v3547_v18 }
  0xc9   :  { %v111_v28 = vmul.f32 %v102_v21, %v53_v24  ;;  %v3567_v37 = vsub.f32 %v158_v15, %v326_v27 }
  0xca   :  { %v3557_v25 = vpack.c.bf16 %v323_v22, %v320_v12  ;;  %v3559_v26 = vsub.f32 %v157_v17, %v323_v22  ;;  %v580_v29 = vsub.f32 %v3547_v18, %v579_v23  ;;  %v225_v18 = vld [vmem:[#allocation2 + $0x78] sm:$0xff] }
  0xcb   :  { %5216 = vst [vmem:[#allocation20_spill] sm:$0xff] %v3567_v37  ;;  %v593_v48 = vand.u32 4294901760, %v3567_v37 }
  0xcc   :  { %5214 = vst [vmem:[#allocation18_spill] sm:$0xff] %v3557_v25  ;;  %5215 = vst [vmem:[#allocation19_spill] sm:$0xff] %v3559_v26  ;;  %185 = vrot.lane.b32.xlu1 %v3472_v16, %s3390_s2  ;;  %v586_v32 = vand.u32 4294901760, %v3559_v26  ;;  %v581_v16 = vand.u32 4294901760, %v580_v29 }
  0xcd   :  { %v142_v35 = vpop.permute.xlu1 %141 }
  0xce   :  { %v151_v36 = vadd.f32 %v142_v35, %v111_v28  ;;  %v587_v38 = vsub.f32 %v3559_v26, %v586_v32  ;;  %v3570_v40 = vpack.c.bf16 %v586_v32, %v579_v23 }
  0xd0   :  { %5217 = vst [vmem:[#allocation21_spill] sm:$0xff] %v3570_v40  ;;  %v159_v43 = vmax.f32 %v151_v36, 0.0  ;;  %189 = vrot.lane.b32.xlu1 %v3499_v39, %s3390_s2  ;;  %v588_v44 = vand.u32 4294901760, %v587_v38  ;;  %v594_v39 = vsub.f32 %v3567_v37, %v593_v48 }
  0xd2   :  { %174 = vrot.lane.b32.xlu0 %v159_v43, %s3388_s5  ;;  %v329_v45 = vand.u32 4294901760, %v159_v43  ;;  %v3575_v46 = vpack.c.bf16 %v588_v44, %v581_v16  ;;  %v595_v58 = vand.u32 4294901760, %v594_v39 }
  0xd4   :  { %193 = vrot.lane.b32.xlu1 %v156_v4, %s3390_s2  ;;  %v3579_v50 = vpack.c.bf16 %v329_v45, %v326_v27  ;;  %v3581_v51 = vsub.f32 %v159_v43, %v329_v45  ;;  %v62_v4 = vlaneseq }
  0xd6   :  { %5218 = vst [vmem:[#allocation22_spill] sm:$0xff] %v3579_v50  ;;  %5219 = vst [vmem:[#allocation23_spill] sm:$0xff] %v3581_v51  ;;  %187 = vrot.lane.b32.xlu0 %v3491_v31, %s3390_s2  ;;  %v600_v52 = vand.u32 4294901760, %v3581_v51  ;;  %v211_v31 = vld [vmem:[#allocation2 + $0x8] sm:$0xff]  ;;  %v3609_v5 = vand.u32 127, %v62_v4 }
  0xd7   :  { %v260_v63 = vsel %vm258_vm0, %v211_v31, 0 }
  0xd8   :  { %197 = vrot.lane.b32.xlu1 %v158_v15, %s3390_s2  ;;  %v601_v56 = vsub.f32 %v3581_v51, %v600_v52  ;;  %v3591_v57 = vpack.c.bf16 %v600_v52, %v593_v48  ;;  %v3600_v0 = vand.u32 4294901760, %v260_v63  ;;  %5222 = vst [vmem:[#allocation26_spill] sm:$0xff] %v3609_v5  ;;  %vm176_vm1 = vcmp.ge.s32.totalorder %v3609_v5, 1 }
  0xd9   :  { %vm201_vm2 = vcmp.lt.s32.totalorder %v3609_v5, 127 }
  0xda   :  { %5220 = vst [vmem:[#allocation24_spill] sm:$0xff] %v3591_v57  ;;  %191 = vrot.lane.b32.xlu0 %v3493_v34, %s3390_s2  ;;  %v602_v60 = vand.u32 4294901760, %v601_v56  ;;  %v3603_v1 = vsub.f32 %v260_v63, %v3600_v0 }
  0xdc   :  { %v3595_v61 = vpack.c.bf16 %v602_v60, %v595_v58  ;;  %5221 = vst [vmem:[#allocation25_spill] sm:$0xff] %v3603_v1  ;;  %v5070_v2 = vand.u32 4294901760, %v3603_v1 }
  0xde   :  { %195 = vrot.lane.b32.xlu0 %v157_v17, %s3390_s2  ;;  %v374_v34 = vsub.f32 %v3603_v1, %v5070_v2 }
  0xe0   :  { %v375_v3 = vand.u32 4294901760, %v374_v34 }
  0xe2   :  { %199 = vrot.lane.b32.xlu0 %v159_v43, %s3390_s2  ;;  %376 = vmatprep.mubr.f32.mxu0 %v375_v3 }
 0x120   :  { %v161_v6 = vpop.permute.xlu1 %160 }
 0x121   :  { %v177_v8 = vsel %vm176_vm1, %v161_v6, 0.0 }
 0x122   :  { %v284_v9 = vand.u32 4294901760, %v177_v8 }
 0x124   :  { %v3616_v14 = vsub.f32 %v177_v8, %v284_v9 }
 0x126   :  { %v5077_v32 = vand.u32 4294901760, %v3616_v14 }
 0x12a   :  { %v163_v11 = vpop.permute.xlu0 %162 }
 0x12b   :  { %v178_v12 = vsel %vm176_vm1, %v163_v11, 0.0 }
 0x12c   :  { %v287_v13 = vand.u32 4294901760, %v178_v12 }
 0x12e   :  { %v3618_v15 = vpack.c.bf16 %v287_v13, %v284_v9  ;;  %v3620_v17 = vsub.f32 %v178_v12, %v287_v13  ;;  %v167_v21 = vpop.permute.xlu0 %166  ;;  %v165_v22 = vpop.permute.xlu1 %164 }
 0x12f   :  { %v180_v23 = vsel %vm176_vm1, %v167_v21, 0.0  ;;  %v179_v24 = vsel %vm176_vm1, %v165_v22, 0.0 }
 0x130   :  { %5223 = vst [vmem:[#allocation27_spill] sm:$0xff] %v3618_v15  ;;  %v5078_v27 = vand.u32 4294901760, %v3620_v17  ;;  %v293_v28 = vand.u32 4294901760, %v180_v23  ;;  %v290_v29 = vand.u32 4294901760, %v179_v24  ;;  %2747 = vmatpush1.bf16.msra.mxu0 %v3618_v15 }
 0x131   :  { %2748 = vmatprep.subr.bf16.mxu0 %v5084_v19 }
 0x132   :  { %v3630_v35 = vsub.f32 %v180_v23, %v293_v28  ;;  %v3632_v36 = vpack.c.bf16 %v293_v28, %v290_v29  ;;  %v3634_v38 = vsub.f32 %v179_v24, %v290_v29  ;;  %v3640_v43 = vpack.c.bf16 %v5078_v27, %v5077_v32 }
 0x134   :  { %5224 = vst [vmem:[#allocation28_spill] sm:$0xff] %v3632_v36  ;;  %5225 = vst [vmem:[#allocation29_spill] sm:$0xff] %v3640_v43  ;;  %v5076_v16 = vand.u32 4294901760, %v3630_v35  ;;  %v5075_v44 = vand.u32 4294901760, %v3634_v38  ;;  %2750 = vmatpush1.bf16.msra.mxu0 %v3632_v36  ;;  %v5252_v36 = vand.u32 4294901760, %v3616_v14 }
 0x135   :  { %2751 = vmatprep.subr.bf16.mxu0 %v5084_v19 }
 0x136   :  { %v169_v45 = vpop.permute.xlu1 %168  ;;  %v3650_v48 = vpack.c.bf16 %v5076_v16, %v5075_v44 }
 0x137   :  { %v181_v39 = vsel %vm176_vm1, %v169_v45, 0.0 }
 0x138   :  { %5226 = vst [vmem:[#allocation30_spill] sm:$0xff] %v3650_v48  ;;  %v296_v52 = vand.u32 4294901760, %v181_v39 }
 0x13a   :  { %v171_v56 = vpop.permute.xlu0 %170  ;;  %v173_v58 = vpop.permute.xlu1 %172  ;;  %v3656_v31 = vsub.f32 %v181_v39, %v296_v52 }
 0x13b   :  { %v182_v60 = vsel %vm176_vm1, %v171_v56, 0.0  ;;  %v183_v9 = vsel %vm176_vm1, %v173_v58, 0.0 }
 0x13c   :  { %v299_v63 = vand.u32 4294901760, %v182_v60  ;;  %v5073_v6 = vand.u32 4294901760, %v3656_v31  ;;  %v302_v13 = vand.u32 4294901760, %v183_v9 }
 0x13e   :  { %v3658_v34 = vpack.c.bf16 %v299_v63, %v296_v52  ;;  %v3660_v3 = vsub.f32 %v182_v60, %v299_v63  ;;  %v186_v4 = vpop.permute.xlu1 %185  ;;  %v3682_v45 = vsub.f32 %v183_v9, %v302_v13 }
 0x13f   :  { %v3677_v21 = vsel %vm201_vm2, %v186_v4, 0.0 }
 0x140   :  { %5227 = vst [vmem:[#allocation31_spill] sm:$0xff] %v3658_v34  ;;  %v5074_v8 = vand.u32 4294901760, %v3660_v3  ;;  %2753 = vmatpush1.bf16.msra.mxu0 %v3658_v34  ;;  %v5083_v24 = vand.u32 4294901760, %v3677_v21  ;;  %v5071_v9 = vand.u32 4294901760, %v3682_v45 }
 0x141   :  { %2754 = vmatprep.subr.bf16.mxu0 %v5084_v19 }
 0x142   :  { %v190_v11 = vpop.permute.xlu1 %189  ;;  %v3673_v12 = vpack.c.bf16 %v5074_v8, %v5073_v6  ;;  %v3697_v63 = vsub.f32 %v3677_v21, %v5083_v24 }
 0x143   :  { %v3686_v39 = vsel %vm201_vm2, %v190_v11, 0.0 }
 0x144   :  { %5228 = vst [vmem:[#allocation32_spill] sm:$0xff] %v3673_v12  ;;  %v175_v22 = vpop.permute.xlu0 %174  ;;  %v5081_v11 = vand.u32 4294901760, %v3686_v39  ;;  %v5079_v33 = vand.u32 4294901760, %v3697_v63  ;;  %v5236_v12 = vand.u32 4294901760, %v3677_v21 }
 0x145   :  { %v184_v23 = vsel %vm176_vm1, %v175_v22, 0.0 }
 0x146   :  { %v305_v28 = vand.u32 4294901760, %v184_v23  ;;  %v194_v29 = vpop.permute.xlu1 %193 }
 0x147   :  { %v3706_v22 = vsel %vm201_vm2, %v194_v29, 0.0  ;;  %v3723_v29 = vsub.f32 %v3686_v39, %v5081_v11 }
 0x148   :  { %v3688_v52 = vpack.c.bf16 %v305_v28, %v302_v13  ;;  %v3690_v56 = vsub.f32 %v184_v23, %v305_v28  ;;  %v188_v58 = vpop.permute.xlu0 %187 }
 0x149   :  { %v203_v60 = vsel %vm201_vm2, %v188_v58, 0.0 }
 0x14a   :  { %5229 = vst [vmem:[#allocation33_spill] sm:$0xff] %v3688_v52  ;;  %v5072_v4 = vand.u32 4294901760, %v3690_v56  ;;  %2756 = vmatpush1.bf16.msra.mxu0 %v3688_v52  ;;  %v335_v13 = vand.u32 4294901760, %v203_v60  ;;  %v198_v23 = vpop.permute.xlu1 %197 }
 0x14b   :  { %2757 = vmatprep.subr.bf16.mxu0 %v5084_v19  ;;  %v3729_v47 = vsel %vm201_vm2, %v198_v23, 0.0 }
 0x14c   :  { %v192_v28 = vpop.permute.xlu0 %191  ;;  %v3708_v58 = vsub.f32 %v203_v60, %v335_v13  ;;  %v3716_v55 = vpack.c.bf16 %v5072_v4, %v5071_v9  ;;  %v5082_v60 = vand.u32 4294901760, %v3706_v22  ;;  %v5090_v44 = vand.u32 4294901760, %v3729_v47 }
 0x14d   :  { %v205_v2 = vsel %vm201_vm2, %v192_v28, 0.0  ;;  %v3797_v48 = vpack.c.bf16 %v335_v13, %v5236_v12  ;;  %v219_v13 = vld [vmem:[#allocation2 + $0x48] sm:$0xff] }
 0x14e   :  { %5230 = vst [vmem:[#allocation34_spill] sm:$0xff] %v3716_v55  ;;  %v341_v62 = vand.u32 4294901760, %v205_v2  ;;  %2759 = vmatpush1.bf16.msra.mxu0 %v3501_v41  ;;  %v5080_v28 = vand.u32 4294901760, %v3708_v58  ;;  %v3749_v32 = vsub.f32 %v3706_v22, %v5082_v60  ;;  %v3767_v60 = vsub.f32 %v3729_v47, %v5090_v44  ;;  %v214_v55 = vld [vmem:[#allocation2 + $0x20] sm:$0xff] }
 0x14f   :  { %2760 = vmatprep.subr.bf16.mxu0 %v5084_v19  ;;  %5237 = vst [vmem:[#allocation38_spill] sm:$0xff] %v3797_v48  ;;  %v3817_v21 = vand.u32 4294901760, %v214_v55 }
 0x150   :  { %v3732_v9 = vsub.f32 %v205_v2, %v341_v62  ;;  %v196_v4 = vpop.permute.xlu0 %195  ;;  %v3740_v8 = vpack.c.bf16 %v5080_v28, %v5079_v33  ;;  %v5088_v2 = vand.u32 4294901760, %v3723_v29  ;;  %v5092_v5 = vand.u32 4294901760, %v3749_v32 }
 0x151   :  { %v207_v6 = vsel %vm201_vm2, %v196_v4, 0.0  ;;  %v213_v4 = vld [vmem:[#allocation2 + $0x18] sm:$0xff]  ;;  %v5093_v40 = vand.u32 4294901760, %v3767_v60 }
 0x152   :  { %5231 = vst [vmem:[#allocation35_spill] sm:$0xff] %v3740_v8  ;;  %v5089_v16 = vand.u32 4294901760, %v3732_v9  ;;  %v347_v23 = vand.u32 4294901760, %v207_v6  ;;  %2762 = vmatpush1.bf16.msra.mxu0 %v3525_v53  ;;  %v5233_v8 = vmov 0.0|0.0  }
 0x153   :  { %2763 = vmatprep.subr.bf16.mxu0 %v5084_v19  ;;  %v210_v19 = vld [vmem:[#allocation2] sm:$0xff] }
 0x154   :  { %v3752_v27 = vsub.f32 %v207_v6, %v347_v23  ;;  %v200_v33 = vpop.permute.xlu0 %199  ;;  %v3762_v11 = vpack.c.bf16 %v5089_v16, %v5088_v2  ;;  %v215_v16 = vld [vmem:[#allocation2 + $0x28] sm:$0xff]  ;;  %v3780_v44 = vand.u32 4294901760, %v210_v19 }
 0x155   :  { %v3756_v28 = vsel %vm201_vm2, %v200_v33, 0.0  ;;  %v263_v33 = vsel %vm258_vm0, %v213_v4, 0  ;;  %v266_v59 = vsel %vm258_vm0, %v215_v16, 0 }
 0x156   :  { %5232 = vst [vmem:[#allocation36_spill] sm:$0xff] %v3762_v11  ;;  %v5091_v6 = vand.u32 4294901760, %v3756_v28  ;;  %2765 = vmatpush1.bf16.msra.mxu0 %v3557_v25  ;;  %v3782_v24 = vand.u32 4294901760, %v263_v33  ;;  %v217_v11 = vld [vmem:[#allocation2 + $0x38] sm:$0xff]  ;;  %v5234_v57 = vand.u32 4294901760, %v3752_v27  ;;  %v3815_v12 = vand.u32 4294901760, %v266_v59 }
 0x157   :  { %2766 = vmatprep.subr.bf16.mxu0 %v5233_v8  ;;  %v269_v43 = vsel %vm258_vm0, %v217_v11, 0  ;;  %v3836_v25 = vsub.f32 %v214_v55, %v3817_v21  ;;  %v218_v55 = vld [vmem:[#allocation2 + $0x40] sm:$0xff]  ;;  %v5256_v15 = vand.u32 4294901760, %v3756_v28 }
 0x158   :  { %v3778_v2 = vsub.f32 %v3756_v28, %v5091_v6  ;;  %v3788_v4 = vpack.c.bf16 %v5234_v57, %v5092_v5  ;;  %v212_v6 = vld [vmem:[#allocation2 + $0x10] sm:$0xff]  ;;  %v3807_v5 = vsub.f32 %v210_v19, %v3780_v44  ;;  %v3820_v11 = vand.u32 4294901760, %v269_v43 }
 0x159   :  { %v3812_v16 = vand.u32 4294901760, %v212_v6  ;;  %5245 = vst [vmem:[#allocation45_spill] sm:$0xff] %v3836_v25  ;;  %v3873_v52 = vand.u32 4294901760, %v218_v55  ;;  %v5261_v28 = vand.u32 4294901760, %v3836_v25 }
 0x15a   :  { %5235 = vst [vmem:[#allocation37_spill] sm:$0xff] %v3788_v4  ;;  %v5094_v7 = vand.u32 4294901760, %v3778_v2  ;;  %2768 = vmatpush1.bf16.msra.mxu0 %v3579_v50  ;;  %5239 = vst [vmem:[#allocation40_spill] sm:$0xff] %v3807_v5  ;;  %v3810_v4 = vsub.f32 %v263_v33, %v3782_v24  ;;  %v3833_v50 = vsub.f32 %v266_v59, %v3815_v12  ;;  %v5248_v59 = vand.u32 4294901760, %v3706_v22 }
 0x15b   :  { %2769 = vmatprep.subr.bf16.mxu0 %v5233_v8  ;;  %v5250_v53 = vand.u32 4294901760, %v3807_v5  ;;  %v5254_v22 = vand.u32 4294901760, %v3634_v38 }
 0x15c   :  { %v3804_v57 = vpack.c.bf16 %v5094_v7, %v5093_v40  ;;  %5240 = vst [vmem:[#allocation41_spill] sm:$0xff] %v3810_v4  ;;  %v5241_v40 = vand.u32 4294901760, %v3686_v39  ;;  %v216_v7 = vld [vmem:[#allocation2 + $0x30] sm:$0xff]  ;;  %5244 = vst [vmem:[#allocation44_spill] sm:$0xff] %v3833_v50  ;;  %v272_v39 = vsel %vm258_vm0, %v219_v13, 0  ;;  %v5251_v41 = vand.u32 4294901760, %v3810_v4 }
 0x15d   :  { %v380_v13 = vsub.f32 %v3807_v5, %v5250_v53  ;;  %v3859_v34 = vand.u32 4294901760, %v272_v39 }
 0x15e   :  { %5238 = vst [vmem:[#allocation39_spill] sm:$0xff] %v3804_v57  ;;  %2771 = vmatpush1.bf16.msra.mxu0 %v3797_v48  ;;  %v3824_v19 = vpack.c.bf16 %v341_v62, %v5241_v40  ;;  %v3829_v48 = vsub.f32 %v212_v6, %v3812_v16  ;;  %v3841_v62 = vsub.f32 %v269_v43, %v3820_v11  ;;  %v3843_v40 = vand.u32 4294901760, %v216_v7  ;;  %v221_v57 = vld [vmem:[#allocation2 + $0x58] sm:$0xff] }
 0x15f   :  { %2772 = vmatprep.subr.bf16.mxu0 %v5233_v8  ;;  %v5247_v6 = vand.u32 4294901760, %v3620_v17  ;;  %v389_v43 = vsub.f32 %v3810_v4, %v5251_v41  ;;  %v275_v53 = vsel %vm258_vm0, %v221_v57, 0  ;;  %v5255_v57 = vand.u32 4294901760, %v3729_v47  ;;  %v223_v41 = vld [vmem:[#allocation2 + $0x68] sm:$0xff] }
 0x160   :  { %5242 = vst [vmem:[#allocation42_spill] sm:$0xff] %v3824_v19  ;;  %5243 = vst [vmem:[#allocation43_spill] sm:$0xff] %v3829_v48  ;;  %v5258_v1 = vand.u32 4294901760, %v3829_v48  ;;  %v3891_v37 = vsub.f32 %v272_v39, %v3859_v34  ;;  %v5260_v47 = vand.u32 4294901760, %v3833_v50 }
 0x161   :  { %5246 = vst [vmem:[#allocation46_spill] sm:$0xff] %v3841_v62  ;;  %v503_v33 = vsub.f32 %v3620_v17, %v5247_v6  ;;  %v496_v6 = vsub.f32 %v3616_v14, %v5252_v36  ;;  %v5253_v36 = vand.u32 4294901760, %v3630_v35  ;;  %v3885_v5 = vpack.c.bf16 %v5256_v15, %v5255_v57  ;;  %v220_v57 = vld [vmem:[#allocation2 + $0x50] sm:$0xff] }
 0x162   :  { %2774 = vmatpush1.bf16.msra.mxu0 %v3824_v19  ;;  %v3850_v19 = vpack.c.bf16 %v347_v23, %v5248_v59  ;;  %v3871_v59 = vsub.f32 %v216_v7, %v3843_v40  ;;  %v510_v23 = vsub.f32 %v3634_v38, %v5254_v22  ;;  %v381_v7 = vand.u32 4294901760, %v380_v13  ;;  %5259 = vst [vmem:[#allocation49_spill] sm:$0xff] %v3891_v37 }
 0x163   :  { %2775 = vmatprep.subr.bf16.mxu0 %v5233_v8  ;;  %v504_v4 = vand.u32 4294901760, %v503_v33  ;;  %5257 = vst [vmem:[#allocation48_spill] sm:$0xff] %v3885_v5  ;;  %v395_v33 = vsub.f32 %v3829_v48, %v5258_v1  ;;  %v497_v51 = vand.u32 4294901760, %v496_v6  ;;  %v390_v22 = vand.u32 4294901760, %v389_v43 }
 0x164   :  { %5249 = vst [vmem:[#allocation47_spill] sm:$0xff] %v3850_v19  ;;  %v404_v15 = vsub.f32 %v3833_v50, %v5260_v47  ;;  %v410_v13 = vsub.f32 %v3836_v25, %v5261_v28  ;;  %v5262_v1 = vand.u32 4294901760, %v3841_v62  ;;  %v278_v43 = vsel %vm258_vm0, %v223_v41, 0 }
 0x165   :  { %v511_v47 = vand.u32 4294901760, %v510_v23  ;;  %v5263_v50 = vand.u32 4294901760, %v3660_v3  ;;  %v2782_v25 = vpack.c.bf16 %v504_v4, %v497_v51  ;;  %v396_v26 = vand.u32 4294901760, %v395_v33 }
 0x166   :  { %2777 = vmatpush1.bf16.msra.mxu0 %v3850_v19  ;;  %v517_v19 = vsub.f32 %v3630_v35, %v5253_v36  ;;  %v3893_v36 = vand.u32 4294901760, %v275_v53  ;;  %v419_v39 = vsub.f32 %v3841_v62, %v5262_v1  ;;  %v3918_v6 = vand.u32 4294901760, %v220_v57 }
 0x167   :  { %2778 = vmatprep.subr.bf16.mxu0 %v5233_v8  ;;  %v531_v28 = vsub.f32 %v3660_v3, %v5263_v50  ;;  %v405_v23 = vand.u32 4294901760, %v404_v15  ;;  %v3923_v41 = vand.u32 4294901760, %v278_v43  ;;  %v222_v50 = vld [vmem:[#allocation2 + $0x60] sm:$0xff]  ;;  %v411_v51 = vand.u32 4294901760, %v410_v13 }
 0x168   :  { %v518_v48 = vand.u32 4294901760, %v517_v19  ;;  %v3916_v1 = vsub.f32 %v275_v53, %v3893_v36  ;;  %v420_v4 = vand.u32 4294901760, %v419_v39  ;;  %v281_v33 = vsel %vm258_vm0, %v225_v18, 0 }
 0x169   :  { %v532_v54 = vand.u32 4294901760, %v531_v28  ;;  %v5266_v62 = vand.u32 4294901760, %v3690_v56  ;;  %v3939_v49 = vsub.f32 %v220_v57, %v3918_v6  ;;  %v5268_v28 = vand.u32 4294901760, %v3682_v45 }
 0x16a   :  { %2780 = vmatpush1.bf16.msra.mxu0 %v3885_v5  ;;  %v3908_v5 = vsub.f32 %v218_v55, %v3873_v52  ;;  %v5264_v55 = vand.u32 4294901760, %v3656_v31 }
 0x16b   :  { %2781 = vmatprep.subr.bf16.mxu0 %v5233_v8 }
 0x16c   :  { %v524_v19 = vsub.f32 %v3656_v31, %v5264_v55  ;;  %v439_v15 = vand.u32 4294901760, %v3908_v5  ;;  %v5267_v55 = vand.u32 4294901760, %v3891_v37 }
 0x16d   :  { %382 = vmatmul.mubr.f32.vlgmr.msra.gmra.mrb[0].mxu0 %v381_v7  ;;  %v5265_v7 = vand.u32 4294901760, %v3871_v59 }
 0x16e   :  { %2783 = vmatpush1.bf16.msra.mxu0 %v2782_v25  ;;  %391 = vmatprep.mubr.f32.mxu0 %v390_v22  ;;  %v545_v25 = vsub.f32 %v3690_v56, %v5266_v62  ;;  %v2785_v22 = vpack.c.bf16 %v518_v48, %v511_v47  ;;  %v434_v13 = vsub.f32 %v3891_v37, %v5267_v55  ;;  %v525_v18 = vand.u32 4294901760, %v524_v19  ;;  %v224_v47 = vld [vmem:[#allocation2 + $0x70] sm:$0xff] }
 0x16f   :  { %2784 = vmatprep.subr.bf16.mxu0 %v5233_v8  ;;  %v425_v53 = vsub.f32 %v3871_v59, %v5265_v7  ;;  %v3941_v7 = vand.u32 4294901760, %v222_v50  ;;  %v538_v62 = vsub.f32 %v3682_v45, %v5268_v28  ;;  %v3949_v48 = vand.u32 4294901760, %v281_v33 }
 0x170   :  { %v546_v55 = vand.u32 4294901760, %v545_v25  ;;  %v2788_v57 = vpack.c.bf16 %v532_v54, %v525_v18  ;;  %v440_v19 = vsub.f32 %v3908_v5, %v439_v15  ;;  %v435_v37 = vand.u32 4294901760, %v434_v13 }
 0x171   :  { %397 = vmatmul.mubr.f32.gmra.mrb[2].mxu0 %v396_v26  ;;  %v3947_v26 = vsub.f32 %v278_v43, %v3923_v41  ;;  %v426_v39 = vand.u32 4294901760, %v425_v53  ;;  %v3959_v43 = vand.u32 4294901760, %v224_v47  ;;  %v539_v28 = vand.u32 4294901760, %v538_v62 }
 0x172   :  { %2786 = vmatpush1.bf16.msra.mxu0 %v2785_v22  ;;  %406 = vmatprep.mubr.f32.mxu0 %v405_v23  ;;  %v454_v22 = vand.u32 4294901760, %v3939_v49  ;;  %v3957_v23 = vsub.f32 %v222_v50, %v3941_v7  ;;  %v5269_v25 = vand.u32 4294901760, %v3916_v1  ;;  %v3966_v18 = vsub.f32 %v281_v33, %v3949_v48 }
 0x173   :  { %2787 = vmatprep.subr.bf16.mxu0 %v5233_v8  ;;  %v463_v53 = vand.u32 4294901760, %v3947_v26  ;;  %v441_v50 = vand.u32 4294901760, %v440_v19  ;;  %v3974_v62 = vsub.f32 %v224_v47, %v3959_v43 }
 0x174   :  { %v449_v54 = vsub.f32 %v3916_v1, %v5269_v25  ;;  %v455_v13 = vsub.f32 %v3939_v49, %v454_v22 }
 0x175   :  { %412 = vmatmul.mubr.f32.gmra.mrb[4].mxu0 %v411_v51  ;;  %v2791_v51 = vpack.c.bf16 %v546_v55, %v539_v28  ;;  %v464_v33 = vsub.f32 %v3947_v26, %v463_v53  ;;  %v478_v55 = vand.u32 4294901760, %v3966_v18  ;;  %v5141_v47 = vand.u32 4294901760, %v3974_v62 }
 0x176   :  { %2789 = vmatpush1.bf16.msra.mxu0 %v2788_v57  ;;  %421 = vmatprep.mubr.f32.mxu0 %v420_v4  ;;  %v469_v4 = vand.u32 4294901760, %v3957_v23  ;;  %v450_v57 = vand.u32 4294901760, %v449_v54 }
 0x177   :  { %2790 = vmatprep.subr.bf16.mxu0 %v5233_v8  ;;  %v479_v28 = vsub.f32 %v3966_v18, %v478_v55  ;;  %v485_v54 = vsub.f32 %v3974_v62, %v5141_v47  ;;  %v5277_v47 = vand.u32 4294901760, %v3767_v60 }
 0x178   :  { %v470_v19 = vsub.f32 %v3957_v23, %v469_v4 }
 0x179   :  { %427 = vmatmul.mubr.f32.gmra.mrb[6].mxu0 %v426_v39  ;;  %v456_v39 = vand.u32 4294901760, %v455_v13  ;;  %v486_v13 = vand.u32 4294901760, %v485_v54  ;;  %v5274_v54 = vand.u32 4294901760, %v3752_v27 }
 0x17a   :  { %2792 = vmatpush1.bf16.msra.mxu0 %v2791_v51  ;;  %436 = vmatprep.mubr.f32.mxu0 %v435_v37  ;;  %v465_v37 = vand.u32 4294901760, %v464_v33  ;;  %v471_v25 = vand.u32 4294901760, %v470_v19  ;;  %v480_v51 = vand.u32 4294901760, %v479_v28  ;;  %v5273_v28 = vand.u32 4294901760, %v3723_v29 }
 0x17b   :  { %2793 = vmatprep.subr.bf16.mxu0 %v5233_v8 }
 0x17d   :  { %442 = vmatmul.mubr.f32.gmra.mrb[8].mxu0 %v441_v50 }
 0x17e   :  { %2795 = vmatpush1.bf16.msra.mxu0 %v3544_v10  ;;  %451 = vmatprep.mubr.f32.mxu0 %v450_v57  ;;  %v5270_v10 = vand.u32 4294901760, %v3708_v58  ;;  %v5271_v57 = vand.u32 4294901760, %v3697_v63 }
 0x17f   :  { %2796 = vmatprep.subr.bf16.mxu0 %v5233_v8 }
 0x180   :  { %v615_v50 = vsub.f32 %v3708_v58, %v5270_v10  ;;  %v608_v33 = vsub.f32 %v3697_v63, %v5271_v57 }
 0x181   :  { %457 = vmatmul.mubr.f32.gmra.mrb[10].mxu0 %v456_v39  ;;  %v5272_v39 = vand.u32 4294901760, %v3732_v9 }
 0x182   :  { %2798 = vmatpush1.bf16.msra.mxu0 %v3549_v20  ;;  %466 = vmatprep.mubr.f32.mxu0 %v465_v37  ;;  %v616_v20 = vand.u32 4294901760, %v615_v50  ;;  %v609_v37 = vand.u32 4294901760, %v608_v33 }
 0x183   :  { %2799 = vmatprep.subr.bf16.mxu0 %v5233_v8  ;;  %v629_v19 = vsub.f32 %v3732_v9, %v5272_v39 }
 0x184   :  { %v2806_v10 = vpack.c.bf16 %v616_v20, %v609_v37 }
 0x185   :  { %472 = vmatmul.mubr.f32.gmra.mrb[12].mxu0 %v471_v25  ;;  %v622_v25 = vsub.f32 %v3723_v29, %v5273_v28 }
 0x186   :  { %2801 = vmatpush1.bf16.msra.mxu0 %v3575_v46  ;;  %481 = vmatprep.mubr.f32.mxu0 %v480_v51  ;;  %v630_v46 = vand.u32 4294901760, %v629_v19  ;;  %v643_v51 = vsub.f32 %v3752_v27, %v5274_v54  ;;  %v650_v54 = vsub.f32 %v3767_v60, %v5277_v47  ;;  %v2821_v47 = vpack.c.bf16 %v3630_v35, %v3634_v38  ;;  %v5279_v38 = vld [vmem:[#allocation12_spill] sm:$0xff] }
 0x187   :  { %2802 = vmatprep.subr.bf16.mxu0 %v5233_v8  ;;  %v623_v50 = vand.u32 4294901760, %v622_v25  ;;  %v5278_v35 = vpack.c.bf16 %v3504_v42, %v3489_v30  ;;  %v5285_v42 = vld [vmem:[#allocation23_spill] sm:$0xff] }
 0x188   :  { %v644_v33 = vand.u32 4294901760, %v643_v51  ;;  %v651_v25 = vand.u32 4294901760, %v650_v54  ;;  %v5299_v54 = vld [vmem:[#allocation49_spill] sm:$0xff] }
 0x189   :  { %487 = vmatmul.mubr.f32.gmra.mrb[14].mxu0 %v486_v13  ;;  %v5275_v13 = vand.u32 4294901760, %v3749_v32  ;;  %v2809_v28 = vpack.c.bf16 %v630_v46, %v623_v50  ;;  %v2818_v46 = vpack.c.bf16 %v3620_v17, %v3616_v14  ;;  %v2824_v14 = vpack.c.bf16 %v3660_v3, %v3656_v31  ;;  %v5280_v31 = vld [vmem:[#allocation14_spill] sm:$0xff] }
 0x18a   :  { %2804 = vmatpush1.bf16.msra.mxu0 %v3595_v61  ;;  %677 = vmatprep.mubr.f32.mxu0 %v3600_v0  ;;  %v5276_v61 = vand.u32 4294901760, %v3778_v2  ;;  %v2827_v17 = vpack.c.bf16 %v3690_v56, %v3682_v45  ;;  %v5281_v3 = vpack.c.bf16 %v5279_v38, %v5280_v31  ;;  %v5282_v45 = vld [vmem:[#allocation19_spill] sm:$0xff]  ;;  %v5283_v56 = vld [vmem:[#allocation17_spill] sm:$0xff]  ;;  %v3391_v38 = vmov 2  }
 0x18b   :  { %2805 = vmatprep.subr.bf16.mxu0 %v5233_v8  ;;  %v636_v57 = vsub.f32 %v3749_v32, %v5275_v13  ;;  %v5284_v30 = vpack.c.bf16 %v5282_v45, %v5283_v56  ;;  %v5288_v13 = vld [vmem:[#allocation25_spill] sm:$0xff]  ;;  %3290 = vset.pattern.permute.xlu1 %v3391_v38  ;;  %v4128_v31 = vld [vmem:[%s5068_s3] sm:$0xff]  ;;  %v4136_v45 = vld [vmem:[%s5068_s3 + $0x8] sm:$0xff] }
 0x18c   :  { %v657_v39 = vsub.f32 %v3778_v2, %v5276_v61  ;;  %v2848_v61 = vpack.c.bf16 %v3752_v27, %v3749_v32  ;;  %v5293_v27 = vld [vmem:[#allocation28_spill] sm:$0xff]  ;;  %227 = vperm.xlu1 %3290, %v4128_v31   ;;  %3291 = vset.pattern.permute.xlu0 %v3391_v38  ;;  %v5310_v56 = vld [vmem:[#allocation29_spill] sm:$0xff]  ;;  %v5321_v38 = vld [vmem:[#allocation15_spill] sm:$0xff] }
 0x18d   :  { %v637_v19 = vand.u32 4294901760, %v636_v57  ;;  %v2842_v57 = vpack.c.bf16 %v3708_v58, %v3697_v63  ;;  %v5289_v63 = vld [vmem:[#allocation40_spill] sm:$0xff]  ;;  %v5290_v58 = vld [vmem:[#allocation27_spill] sm:$0xff]  ;;  %231 = vperm.xlu0 %3291, %v4136_v45  }
 0x18e   :  { %2807 = vmatpush1.bf16.msra.mxu0 %v2806_v10  ;;  %v658_v20 = vand.u32 4294901760, %v657_v39  ;;  %v5286_v10 = vld [vmem:[#allocation20_spill] sm:$0xff]  ;;  %v2851_v39 = vpack.c.bf16 %v3778_v2, %v3767_v60  ;;  %v5295_v60 = vld [vmem:[#allocation45_spill] sm:$0xff]  ;;  %v5296_v2 = vld [vmem:[#allocation31_spill] sm:$0xff] }
 0x18f   :  { %2808 = vmatprep.subr.bf16.mxu0 %v5233_v8  ;;  %v2812_v37 = vpack.c.bf16 %v644_v33, %v637_v19  ;;  %v5287_v50 = vpack.c.bf16 %v5285_v42, %v5286_v10  ;;  %v2845_v33 = vpack.c.bf16 %v3732_v9, %v3723_v29  ;;  %v5291_v9 = vld [vmem:[#allocation41_spill] sm:$0xff]  ;;  %v5292_v29 = vld [vmem:[#allocation43_spill] sm:$0xff]  ;;  %v5294_v32 = vld [vmem:[#allocation44_spill] sm:$0xff] }
 0x190   :  { %v2815_v51 = vpack.c.bf16 %v658_v20, %v651_v25  ;;  %v5298_v19 = vld [vmem:[#allocation33_spill] sm:$0xff]  ;;  %v5300_v20 = vld [vmem:[#allocation11_spill] sm:$0xff]  ;;  %v5302_v25 = vld [vmem:[#allocation18_spill] sm:$0xff]  ;;  %v5312_v10 = vand.u32 4294901760, %v5292_v29 }
 0x191   :  { %v4146_v42 = vld [vmem:[%s5068_s3 + $0x10] sm:$0xff] }
 0x192   :  { %2810 = vmatpush1.bf16.msra.mxu0 %v2809_v28  ;;  %v5297_v28 = vld [vmem:[#allocation46_spill] sm:$0xff]  ;;  %235 = vperm.xlu1 %3290, %v4146_v42  }
 0x193   :  { %2811 = vmatprep.subr.bf16.mxu0 %v5233_v8 }
 0x196   :  { %2813 = vmatpush1.bf16.msra.mxu0 %v2812_v37  ;;  %v5301_v37 = vld [vmem:[#allocation13_spill] sm:$0xff] }
 0x197   :  { %2814 = vmatprep.subr.bf16.mxu0 %v5233_v8 }
 0x19a   :  { %2816 = vmatpush1.bf16.msra.mxu0 %v2815_v51  ;;  %v5303_v51 = vld [vmem:[#allocation22_spill] sm:$0xff] }
 0x19b   :  { %2817 = vmatprep.subr.bf16.mxu0 %v5233_v8 }
 0x19d   :  { %679 = vmatmul.mubr.f32.vlgmr.msra.gmra.mrb[0].mxu0 %v3780_v44 }
 0x19e   :  { %2819 = vmatpush1.bf16.msra.mxu0 %v2818_v46  ;;  %684 = vmatprep.mubr.f32.mxu0 %v3782_v24  ;;  %v5304_v46 = vand.u32 4294901760, %v5288_v13 }
 0x19f   :  { %2820 = vmatprep.subr.bf16.mxu0 %v5233_v8 }
 0x1a1   :  { %686 = vmatmul.mubr.f32.gmra.mrb[2].mxu0 %v3812_v16 }
 0x1a2   :  { %2822 = vmatpush1.bf16.msra.mxu0 %v2821_v47  ;;  %691 = vmatprep.mubr.f32.mxu0 %v3815_v12  ;;  %v5305_v47 = vld [vmem:[#allocation38_spill] sm:$0xff] }
 0x1a3   :  { %2823 = vmatprep.subr.bf16.mxu0 %v5233_v8 }
 0x1a5   :  { %693 = vmatmul.mubr.f32.gmra.mrb[4].mxu0 %v3817_v21 }
 0x1a6   :  { %2825 = vmatpush1.bf16.msra.mxu0 %v2824_v14  ;;  %698 = vmatprep.mubr.f32.mxu0 %v3820_v11  ;;  %v5306_v14 = vld [vmem:[#allocation42_spill] sm:$0xff] }
 0x1a7   :  { %2826 = vmatprep.subr.bf16.mxu0 %v5233_v8 }
 0x1a9   :  { %700 = vmatmul.mubr.f32.gmra.mrb[6].mxu0 %v3843_v40 }
 0x1aa   :  { %2828 = vmatpush1.bf16.msra.mxu0 %v2827_v17  ;;  %705 = vmatprep.mubr.f32.mxu0 %v3859_v34  ;;  %v5307_v17 = vld [vmem:[#allocation47_spill] sm:$0xff] }
 0x1ab   :  { %2829 = vmatprep.subr.bf16.mxu0 %v5233_v8 }
 0x1ad   :  { %707 = vmatmul.mubr.f32.gmra.mrb[8].mxu0 %v3873_v52 }
 0x1ae   :  { %2831 = vmatpush1.bf16.msra.mxu0 %v5278_v35  ;;  %712 = vmatprep.mubr.f32.mxu0 %v3893_v36  ;;  %v5308_v35 = vld [vmem:[#allocation48_spill] sm:$0xff] }
 0x1af   :  { %2832 = vmatprep.subr.bf16.mxu0 %v5233_v8 }
 0x1b1   :  { %714 = vmatmul.mubr.f32.gmra.mrb[10].mxu0 %v3918_v6 }
 0x1b2   :  { %2834 = vmatpush1.bf16.msra.mxu0 %v5281_v3  ;;  %719 = vmatprep.mubr.f32.mxu0 %v3923_v41  ;;  %v5309_v3 = vand.u32 4294901760, %v5289_v63 }
 0x1b3   :  { %2835 = vmatprep.subr.bf16.mxu0 %v5233_v8 }
 0x1b5   :  { %721 = vmatmul.mubr.f32.gmra.mrb[12].mxu0 %v3941_v7 }
 0x1b6   :  { %2837 = vmatpush1.bf16.msra.mxu0 %v5284_v30  ;;  %726 = vmatprep.mubr.f32.mxu0 %v3949_v48  ;;  %v5311_v30 = vand.u32 4294901760, %v5291_v9 }
 0x1b7   :  { %2838 = vmatprep.subr.bf16.mxu0 %v5233_v8 }
 0x1b9   :  { %728 = vmatmul.mubr.f32.gmra.mrb[14].mxu0 %v3959_v43 }
 0x1ba   :  { %2840 = vmatpush1.bf16.msra.mxu0 %v5287_v50  ;;  %847 = vmatprep.mubr.f32.mxu0 %v5288_v13  ;;  %v4154_v50 = vld [vmem:[%s5068_s3 + $0x20] sm:$0xff]  ;;  %v5313_v13 = vld [vmem:[#allocation30_spill] sm:$0xff] }
 0x1bb   :  { %2841 = vmatprep.subr.bf16.mxu0 %v5233_v8  ;;  %243 = vperm.xlu0 %3291, %v4154_v50  }
 0x1be   :  { %2843 = vmatpush1.bf16.msra.mxu0 %v2842_v57  ;;  %v5314_v57 = vand.u32 4294901760, %v5294_v32 }
 0x1bf   :  { %2844 = vmatprep.subr.bf16.mxu0 %v5233_v8 }
 0x1c2   :  { %2846 = vmatpush1.bf16.msra.mxu0 %v2845_v33  ;;  %v4164_v33 = vld [vmem:[%s5068_s3 + $0x18] sm:$0xff] }
 0x1c3   :  { %2847 = vmatprep.subr.bf16.mxu0 %v5233_v8  ;;  %239 = vperm.xlu1 %3290, %v4164_v33  }
 0x1c6   :  { %2849 = vmatpush1.bf16.msra.mxu0 %v2848_v61  ;;  %v5315_v61 = vand.u32 4294901760, %v5295_v60 }
 0x1c7   :  { %2850 = vmatprep.subr.bf16.mxu0 %v5233_v8 }
 0x1ca   :  { %2852 = vmatpush1.bf16.msra.mxu0 %v2851_v39  ;;  %v4172_v39 = vld [vmem:[%s5068_s3 + $0x30] sm:$0xff] }
 0x1cb   :  { %2853 = vmatprep.subr.bf16.mxu0 %v5233_v8  ;;  %251 = vperm.xlu0 %3291, %v4172_v39  }
 0x1cd   :  { %850 = vmatmul.mubr.f32.vlgmr.msra.gmra.mrb[0].mxu0 %v5289_v63  ;;  %v5316_v63 = vld [vmem:[#allocation32_spill] sm:$0xff] }
 0x1ce   :  { %2855 = vmatpush1.bf16.msra.mxu0 %v5290_v58  ;;  %856 = vmatprep.mubr.f32.mxu0 %v5291_v9  ;;  %v5317_v9 = vand.u32 4294901760, %v5297_v28 }
 0x1cf   :  { %2856 = vmatprep.subr.bf16.mxu0 %v5233_v8 }
 0x1d1   :  { %859 = vmatmul.mubr.f32.gmra.mrb[2].mxu0 %v5292_v29  ;;  %v4182_v29 = vld [vmem:[%s5068_s3 + $0x28] sm:$0xff] }
 0x1d2   :  { %2858 = vmatpush1.bf16.msra.mxu0 %v5293_v27  ;;  %865 = vmatprep.mubr.f32.mxu0 %v5294_v32  ;;  %v5318_v32 = vand.u32 4294901760, %v3871_v59 }
 0x1d3   :  { %2859 = vmatprep.subr.bf16.mxu0 %v5233_v8  ;;  %247 = vperm.xlu1 %3290, %v4182_v29  }
 0x1d5   :  { %868 = vmatmul.mubr.f32.gmra.mrb[4].mxu0 %v5295_v60  ;;  %v5319_v60 = vld [vmem:[#allocation34_spill] sm:$0xff] }
 0x1d6   :  { %2861 = vmatpush1.bf16.msra.mxu0 %v5296_v2  ;;  %874 = vmatprep.mubr.f32.mxu0 %v5297_v28  ;;  %v4194_v28 = vld [vmem:[%s5068_s3 + $0x38] sm:$0xff] }
 0x1d7   :  { %2862 = vmatprep.subr.bf16.mxu0 %v5233_v8  ;;  %255 = vperm.xlu1 %3290, %v4194_v28  }
 0x1d9   :  { %877 = vmatmul.mubr.f32.gmra.mrb[6].mxu0 %v3871_v59  ;;  %v5322_v59 = vand.u32 4294901760, %v3916_v1 }
 0x1da   :  { %2864 = vmatpush1.bf16.msra.mxu0 %v5298_v19  ;;  %883 = vmatprep.mubr.f32.mxu0 %v5299_v54 }
 0x1db   :  { %2865 = vmatprep.subr.bf16.mxu0 %v5233_v8 }
 0x1dd   :  { %886 = vmatmul.mubr.f32.gmra.mrb[8].mxu0 %v3908_v5  ;;  %v5324_v5 = vld [vmem:[#allocation21_spill] sm:$0xff] }
 0x1de   :  { %2867 = vmatpush1.bf16.msra.mxu0 %v5300_v20  ;;  %892 = vmatprep.mubr.f32.mxu0 %v3916_v1  ;;  %v5326_v1 = vld [vmem:[#allocation24_spill] sm:$0xff] }
 0x1df   :  { %2868 = vmatprep.subr.bf16.mxu0 %v5233_v8 }
 0x1e1   :  { %895 = vmatmul.mubr.f32.gmra.mrb[10].mxu0 %v3939_v49  ;;  %v5325_v49 = vand.u32 4294901760, %v3974_v62 }
 0x1e2   :  { %2870 = vmatpush1.bf16.msra.mxu0 %v5301_v37  ;;  %901 = vmatprep.mubr.f32.mxu0 %v3947_v26  ;;  %v5328_v26 = vld [vmem:[#allocation36_spill] sm:$0xff] }
 0x1e3   :  { %2871 = vmatprep.subr.bf16.mxu0 %v5233_v8 }
 0x1e5   :  { %904 = vmatmul.mubr.f32.gmra.mrb[12].mxu0 %v3957_v23  ;;  %v5330_v23 = vld [vmem:[#allocation39_spill] sm:$0xff] }
 0x1e6   :  { %2873 = vmatpush1.bf16.msra.mxu0 %v5302_v25  ;;  %910 = vmatprep.mubr.f32.mxu0 %v3966_v18 }
 0x1e7   :  { %2874 = vmatprep.subr.bf16.mxu0 %v5233_v8 }
 0x1e9   :  { %913 = vmatmul.mubr.f32.gmra.mrb[14].mxu0 %v3974_v62 }
 0x1ea   :  { %2876 = vmatpush1.bf16.msra.mxu0 %v5303_v51  ;;  %1009 = vmatprep.mubr.f32.mxu0 %v5304_v46  ;;  %v5320_v46 = vand.u32 4294901760, %v5299_v54  ;;  %v5323_v54 = vld [vmem:[#allocation16_spill] sm:$0xff] }
 0x1eb   :  { %2877 = vmatprep.subr.bf16.mxu0 %v5233_v8 }
 0x1ee   :  { %2879 = vmatpush1.bf16.msra.mxu0 %v5305_v47 }
 0x1ef   :  { %2880 = vmatprep.subr.bf16.mxu0 %v5233_v8 }
 0x1f2   :  { %2882 = vmatpush1.bf16.msra.mxu0 %v5306_v14 }
 0x1f3   :  { %2883 = vmatprep.subr.bf16.mxu0 %v5233_v8 }
 0x1f6   :  { %2885 = vmatpush1.bf16.msra.mxu0 %v5307_v17 }
 0x1f7   :  { %2886 = vmatprep.subr.bf16.mxu0 %v5233_v8 }
 0x1fa   :  { %2888 = vmatpush1.bf16.msra.mxu0 %v5308_v35 }
 0x1fb   :  { %2889 = vmatprep.subr.bf16.mxu0 %v5233_v8 }
 0x1fd   :  { %1013 = vmatmul.mubr.f32.vlgmr.msra.gmra.mrb[0].mxu0 %v5309_v3 }
 0x1fe   :  { %2891 = vmatpush1.bf16.msra.mxu0 %v5310_v56  ;;  %1020 = vmatprep.mubr.f32.mxu0 %v5311_v30 }
 0x1ff   :  { %2892 = vmatprep.subr.bf16.mxu0 %v5233_v8 }
 0x201   :  { %1024 = vmatmul.mubr.f32.gmra.mrb[2].mxu0 %v5312_v10 }
 0x202   :  { %2894 = vmatpush1.bf16.msra.mxu0 %v5313_v13  ;;  %1031 = vmatprep.mubr.f32.mxu0 %v5314_v57 }
 0x203   :  { %2895 = vmatprep.subr.bf16.mxu0 %v5233_v8 }
 0x205   :  { %1035 = vmatmul.mubr.f32.gmra.mrb[4].mxu0 %v5315_v61 }
 0x206   :  { %2897 = vmatpush1.bf16.msra.mxu0 %v5316_v63  ;;  %1042 = vmatprep.mubr.f32.mxu0 %v5317_v9 }
 0x207   :  { %2898 = vmatprep.subr.bf16.mxu0 %v5233_v8 }
 0x209   :  { %1046 = vmatmul.mubr.f32.gmra.mrb[6].mxu0 %v5318_v32 }
 0x20a   :  { %2900 = vmatpush1.bf16.msra.mxu0 %v5319_v60  ;;  %1053 = vmatprep.mubr.f32.mxu0 %v5320_v46 }
 0x20b   :  { %2901 = vmatprep.subr.bf16.mxu0 %v5233_v8 }
 0x20d   :  { %1057 = vmatmul.mubr.f32.gmra.mrb[8].mxu0 %v439_v15  ;;  %v5327_v15 = vld [vmem:[#allocation35_spill] sm:$0xff] }
 0x20e   :  { %2903 = vmatpush1.bf16.msra.mxu0 %v5321_v38  ;;  %1064 = vmatprep.mubr.f32.mxu0 %v5322_v59 }
 0x20f   :  { %2904 = vmatprep.subr.bf16.mxu0 %v5233_v8 }
 0x211   :  { %1068 = vmatmul.mubr.f32.gmra.mrb[10].mxu0 %v454_v22  ;;  %v5329_v22 = vld [vmem:[#allocation37_spill] sm:$0xff] }
 0x212   :  { %2906 = vmatpush1.bf16.msra.mxu0 %v5323_v54  ;;  %1075 = vmatprep.mubr.f32.mxu0 %v463_v53 }
 0x213   :  { %2907 = vmatprep.subr.bf16.mxu0 %v5233_v8 }
 0x215   :  { %1079 = vmatmul.mubr.f32.gmra.mrb[12].mxu0 %v469_v4 }
 0x216   :  { %2909 = vmatpush1.bf16.msra.mxu0 %v5324_v5  ;;  %1086 = vmatprep.mubr.f32.mxu0 %v478_v55 }
 0x217   :  { %2910 = vmatprep.subr.bf16.mxu0 %v5233_v8 }
 0x219   :  { %1090 = vmatmul.mubr.f32.gmra.mrb[14].mxu0 %v5325_v49 }
 0x21a   :  { %2912 = vmatpush1.bf16.msra.mxu0 %v5326_v1  ;;  %1232 = vmatprep.mubr.f32.mxu0 %v3600_v0 }
 0x21b   :  { %2913 = vmatprep.subr.bf16.mxu0 %v5233_v8 }
 0x21e   :  { %2915 = vmatpush1.bf16.msra.mxu0 %v5327_v15 }
 0x21f   :  { %2916 = vmatprep.subr.bf16.mxu0 %v5233_v8 }
 0x222   :  { %2918 = vmatpush1.bf16.msra.mxu0 %v5328_v26 }
 0x223   :  { %2919 = vmatprep.subr.bf16.mxu0 %v5233_v8 }
 0x226   :  { %2921 = vmatpush1.bf16.msra.mxu0 %v5329_v22 }
 0x227   :  { %2922 = vmatprep.subr.bf16.mxu0 %v5233_v8 }
 0x22a   :  { %2924 = vmatpush1.bf16.msra.mxu0 %v5330_v23 }
 0x22b   :  { %2925 = vmatprep.subr.bf16.mxu0 %v5233_v8 }
 0x22d   :  { %1234 = vmatmul.mubr.f32.vlgmr.msra.gmra.mrb[0].mxu0 %v3780_v44 }
 0x22e   :  { %2927 = vmatpush1.bf16.msra.mxu0 %v5290_v58  ;;  %1239 = vmatprep.mubr.f32.mxu0 %v3782_v24 }
 0x22f   :  { %2928 = vmatprep.subr.bf16.mxu0 %v5233_v8 }
 0x231   :  { %1241 = vmatmul.mubr.f32.gmra.mrb[2].mxu0 %v3812_v16 }
 0x232   :  { %2930 = vmatpush1.bf16.msra.mxu0 %v5293_v27  ;;  %1246 = vmatprep.mubr.f32.mxu0 %v3815_v12 }
 0x233   :  { %2931 = vmatprep.subr.bf16.mxu0 %v5233_v8 }
 0x235   :  { %1248 = vmatmul.mubr.f32.gmra.mrb[4].mxu0 %v3817_v21 }
 0x236   :  { %2933 = vmatpush1.bf16.msra.mxu0 %v5296_v2  ;;  %1253 = vmatprep.mubr.f32.mxu0 %v3820_v11 }
 0x237   :  { %2934 = vmatprep.subr.bf16.mxu0 %v5233_v8 }
 0x239   :  { %1255 = vmatmul.mubr.f32.gmra.mrb[6].mxu0 %v3843_v40 }
 0x23a   :  { %2936 = vmatpush1.bf16.msra.mxu0 %v5298_v19  ;;  %1260 = vmatprep.mubr.f32.mxu0 %v3859_v34 }
 0x23b   :  { %2937 = vmatprep.subr.bf16.mxu0 %v5233_v8 }
 0x23d   :  { %1262 = vmatmul.mubr.f32.gmra.mrb[8].mxu0 %v3873_v52 }
 0x23e   :  { %2939 = vmatpush1.bf16.msra.mxu0 %v5300_v20  ;;  %1267 = vmatprep.mubr.f32.mxu0 %v3893_v36 }
 0x23f   :  { %2940 = vmatprep.subr.bf16.mxu0 %v5233_v8 }
 0x241   :  { %1269 = vmatmul.mubr.f32.gmra.mrb[10].mxu0 %v3918_v6 }
 0x242   :  { %2942 = vmatpush1.bf16.msra.mxu0 %v5301_v37  ;;  %1274 = vmatprep.mubr.f32.mxu0 %v3923_v41 }
 0x243   :  { %2943 = vmatprep.subr.bf16.mxu0 %v5233_v8 }
 0x245   :  { %1276 = vmatmul.mubr.f32.gmra.mrb[12].mxu0 %v3941_v7 }
 0x246   :  { %2945 = vmatpush1.bf16.msra.mxu0 %v5302_v25  ;;  %1281 = vmatprep.mubr.f32.mxu0 %v3949_v48 }
 0x247   :  { %2946 = vmatprep.subr.bf16.mxu0 %v5233_v8 }
 0x249   :  { %1283 = vmatmul.mubr.f32.gmra.mrb[14].mxu0 %v3959_v43 }
 0x24a   :  { %2948 = vmatpush1.bf16.msra.mxu0 %v5303_v51  ;;  %1377 = vmatprep.mubr.f32.mxu0 %v3600_v0  ;;  %v228_v0 = vpop.permute.xlu1 %227 }
 0x24b   :  { %2949 = vmatprep.subr.bf16.mxu0 %v5233_v8 }
 0x24e   :  { %2951 = vmatpush1.bf16.msra.mxu0 %v5305_v47 }
 0x24f   :  { %2952 = vmatprep.subr.bf16.mxu0 %v5233_v8 }
 0x252   :  { %2954 = vmatpush1.bf16.msra.mxu0 %v5306_v14 }
 0x253   :  { %2955 = vmatprep.subr.bf16.mxu0 %v5233_v8 }
 0x256   :  { %2957 = vmatpush1.bf16.msra.mxu0 %v5307_v17 }
 0x257   :  { %2958 = vmatprep.subr.bf16.mxu0 %v5233_v8 }
 0x25a   :  { %2960 = vmatpush1.bf16.msra.mxu0 %v5308_v35 }
 0x25d   :  { %1379 = vmatmul.mubr.f32.vlgmr.msra.gmra.mrb[0].mxu0 %v3780_v44 }
 0x25e   :  { %1384 = vmatprep.mubr.f32.mxu0 %v3782_v24 }
 0x261   :  { %1386 = vmatmul.mubr.f32.gmra.mrb[2].mxu0 %v3812_v16 }
 0x262   :  { %1391 = vmatprep.mubr.f32.mxu0 %v3815_v12  ;;  %v232_v12 = vpop.permute.xlu0 %231 }
 0x265   :  { %1393 = vmatmul.mubr.f32.gmra.mrb[4].mxu0 %v3817_v21 }
 0x266   :  { %1398 = vmatprep.mubr.f32.mxu0 %v3820_v11  ;;  %v244_v3 = vpop.permute.xlu0 %243 }
 0x269   :  { %1400 = vmatmul.mubr.f32.gmra.mrb[6].mxu0 %v3843_v40 }
 0x26a   :  { %1405 = vmatprep.mubr.f32.mxu0 %v3859_v34 }
 0x26d   :  { %1407 = vmatmul.mubr.f32.gmra.mrb[8].mxu0 %v3873_v52 }
 0x26e   :  { %1412 = vmatprep.mubr.f32.mxu0 %v3893_v36  ;;  %v236_v36 = vpop.permute.xlu1 %235 }
 0x271   :  { %1414 = vmatmul.mubr.f32.gmra.mrb[10].mxu0 %v3918_v6 }
 0x272   :  { %1419 = vmatprep.mubr.f32.mxu0 %v3923_v41  ;;  %v240_v58 = vpop.permute.xlu1 %239 }
 0x275   :  { %1421 = vmatmul.mubr.f32.gmra.mrb[12].mxu0 %v3941_v7 }
 0x276   :  { %1426 = vmatprep.mubr.f32.mxu0 %v3949_v48  ;;  %v248_v38 = vpop.permute.xlu1 %247 }
 0x279   :  { %1428 = vmatmul.mubr.f32.gmra.mrb[14].mxu0 %v3959_v43 }
 0x330   :  { %v1380_v44 = vpop.f32.mrb[0].mxu0 }
 0x331   :  { %v3177_v24 = vadd.f32 %v1380_v44, %v228_v0  ;;  %v1382_v16 = vpop.f32.mrb[1].mxu0 }
 0x333   :  { %v4282_v34 = vmax.f32 %v3177_v24, 0.0  ;;  %v252_v24 = vpop.permute.xlu0 %251 }
 0x334   :  { %v1387_v52 = vpop.f32.mrb[2].mxu0 }
 0x335   :  { %v3178_v21 = vadd.f32 %v1387_v52, %v232_v12  ;;  %v1389_v11 = vpop.f32.mrb[3].mxu0  ;;  %1441 = vrot.lane.b32.xlu0 %v4282_v34, %s3388_s5  ;;  %v1586_v40 = vand.u32 4294901760, %v4282_v34 }
 0x337   :  { %v4287_v6 = vmax.f32 %v3178_v21, 0.0  ;;  %v4290_v41 = vsub.f32 %v4282_v34, %v1586_v40 }
 0x338   :  { %v1394_v7 = vpop.f32.mrb[4].mxu0 }
 0x339   :  { %v3179_v48 = vadd.f32 %v1394_v7, %v236_v36  ;;  %v1396_v43 = vpop.f32.mrb[5].mxu0  ;;  %1443 = vrot.lane.b32.xlu1 %v4287_v6, %s3388_s5  ;;  %v1589_v53 = vand.u32 4294901760, %v4287_v6  ;;  %v1829_v18 = vand.u32 4294901760, %v4290_v41 }
 0x33b   :  { %v4296_v4 = vmax.f32 %v3179_v48, 0.0  ;;  %v4298_v62 = vpack.c.bf16 %v1589_v53, %v1586_v40  ;;  %v4301_v55 = vsub.f32 %v4287_v6, %v1589_v53  ;;  %v1830_v2 = vsub.f32 %v4290_v41, %v1829_v18 }
 0x33c   :  { %v1401_v27 = vpop.f32.mrb[6].mxu0 }
 0x33d   :  { %5331 = vst [vmem:[#allocation12_spill] sm:$0xff] %v4298_v62  ;;  %v3180_v19 = vadd.f32 %v1401_v27, %v240_v58  ;;  %v1403_v20 = vpop.f32.mrb[7].mxu0  ;;  %1445 = vrot.lane.b32.xlu0 %v4296_v4, %s3388_s5  ;;  %v1592_v37 = vand.u32 4294901760, %v4296_v4  ;;  %v1836_v25 = vand.u32 4294901760, %v4301_v55  ;;  %v1831_v30 = vand.u32 4294901760, %v1830_v2 }
 0x33f   :  { %v4310_v47 = vmax.f32 %v3180_v19, 0.0  ;;  %v4313_v14 = vsub.f32 %v4296_v4, %v1592_v37  ;;  %v1837_v17 = vsub.f32 %v4301_v55, %v1836_v25  ;;  %v4316_v35 = vpack.c.bf16 %v1836_v25, %v1829_v18  ;;  %v256_v18 = vpop.permute.xlu1 %255 }
 0x340   :  { %v1408_v56 = vpop.f32.mrb[8].mxu0 }
 0x341   :  { %5332 = vst [vmem:[#allocation14_spill] sm:$0xff] %v4313_v14  ;;  %5333 = vst [vmem:[#allocation19_spill] sm:$0xff] %v4316_v35  ;;  %v3181_v10 = vadd.f32 %v1408_v56, %v244_v3  ;;  %v1410_v13 = vpop.f32.mrb[9].mxu0  ;;  %1447 = vrot.lane.b32.xlu1 %v4310_v47, %s3388_s5  ;;  %v1595_v57 = vand.u32 4294901760, %v4310_v47  ;;  %v1838_v61 = vand.u32 4294901760, %v1837_v17  ;;  %v1843_v63 = vand.u32 4294901760, %v4313_v14 }
 0x343   :  { %v1437_v9 = vmax.f32 %v3181_v10, 0.0  ;;  %v4322_v32 = vpack.c.bf16 %v1595_v57, %v1592_v37  ;;  %v4325_v60 = vsub.f32 %v4310_v47, %v1595_v57  ;;  %v4327_v46 = vpack.c.bf16 %v1838_v61, %v1831_v30 }
 0x344   :  { %v1415_v59 = vpop.f32.mrb[10].mxu0  ;;  %v1844_v54 = vsub.f32 %v4313_v14, %v1843_v63 }
 0x345   :  { %5334 = vst [vmem:[#allocation17_spill] sm:$0xff] %v4322_v32  ;;  %5335 = vst [vmem:[#allocation23_spill] sm:$0xff] %v4325_v60  ;;  %v3182_v5 = vadd.f32 %v1415_v59, %v248_v38  ;;  %v1417_v49 = vpop.f32.mrb[11].mxu0  ;;  %1449 = vrot.lane.b32.xlu0 %v1437_v9, %s3388_s5  ;;  %v1598_v1 = vand.u32 4294901760, %v1437_v9  ;;  %v1850_v15 = vand.u32 4294901760, %v4325_v60 }
 0x346   :  { %v1845_v12 = vand.u32 4294901760, %v1844_v54 }
 0x347   :  { %v1438_v22 = vmax.f32 %v3182_v5, 0.0  ;;  %v4334_v23 = vsub.f32 %v1437_v9, %v1598_v1  ;;  %v1851_v0 = vsub.f32 %v4325_v60, %v1850_v15  ;;  %v4337_v44 = vpack.c.bf16 %v1850_v15, %v1843_v63 }
 0x348   :  { %v1422_v16 = vpop.f32.mrb[12].mxu0 }
 0x349   :  { %5336 = vst [vmem:[#allocation20_spill] sm:$0xff] %v4334_v23  ;;  %5337 = vst [vmem:[#allocation25_spill] sm:$0xff] %v4337_v44  ;;  %v3183_v52 = vadd.f32 %v1422_v16, %v252_v24  ;;  %v1424_v21 = vpop.f32.mrb[13].mxu0  ;;  %1451 = vrot.lane.b32.xlu1 %v1438_v22, %s3388_s5  ;;  %v1601_v11 = vand.u32 4294901760, %v1438_v22  ;;  %v1852_v40 = vand.u32 4294901760, %v1851_v0  ;;  %v1857_v36 = vand.u32 4294901760, %v4334_v23 }
 0x34b   :  { %v1439_v7 = vmax.f32 %v3183_v52, 0.0  ;;  %v4341_v48 = vpack.c.bf16 %v1601_v11, %v1598_v1  ;;  %v4343_v43 = vsub.f32 %v1438_v22, %v1601_v11  ;;  %v4345_v53 = vpack.c.bf16 %v1852_v40, %v1845_v12 }
 0x34c   :  { %v1429_v58 = vpop.f32.mrb[14].mxu0  ;;  %v1858_v27 = vsub.f32 %v4334_v23, %v1857_v36 }
 0x34d   :  { %5338 = vst [vmem:[#allocation40_spill] sm:$0xff] %v4341_v48  ;;  %5339 = vst [vmem:[#allocation27_spill] sm:$0xff] %v4343_v43  ;;  %v3184_v2 = vadd.f32 %v1429_v58, %v256_v18  ;;  %v1431_v19 = vpop.f32.mrb[15].mxu0  ;;  %1453 = vrot.lane.b32.xlu0 %v1439_v7, %s3388_s5  ;;  %v1604_v20 = vand.u32 4294901760, %v1439_v7  ;;  %v1864_v37 = vand.u32 4294901760, %v4343_v43 }
 0x34e   :  { %v1859_v13 = vand.u32 4294901760, %v1858_v27 }
 0x34f   :  { %v1440_v17 = vmax.f32 %v3184_v2, 0.0  ;;  %v4352_v3 = vsub.f32 %v1439_v7, %v1604_v20  ;;  %v1865_v56 = vsub.f32 %v4343_v43, %v1864_v37  ;;  %v4355_v30 = vpack.c.bf16 %v1864_v37, %v1857_v36  ;;  %v1504_v43 = vld [vmem:[#allocation5 + $0x78] sm:$0xff] }
 0x351   :  { %5340 = vst [vmem:[#allocation41_spill] sm:$0xff] %v4352_v3  ;;  %5341 = vst [vmem:[#allocation43_spill] sm:$0xff] %v4355_v30  ;;  %1455 = vrot.lane.b32.xlu1 %v1440_v17, %s3388_s5  ;;  %1465 = vrot.lane.b32.xlu0 %v4282_v34, %s3390_s2  ;;  %v1607_v10 = vand.u32 4294901760, %v1440_v17  ;;  %v1866_v57 = vand.u32 4294901760, %v1865_v56  ;;  %v1871_v61 = vand.u32 4294901760, %v4352_v3  ;;  %v1496_v30 = vld [vmem:[#allocation5 + $0x38] sm:$0xff] }
 0x353   :  { %v4361_v63 = vpack.c.bf16 %v1607_v10, %v1604_v20  ;;  %v4363_v38 = vsub.f32 %v1440_v17, %v1607_v10  ;;  %v4365_v59 = vpack.c.bf16 %v1866_v57, %v1859_v13  ;;  %v1872_v54 = vsub.f32 %v4352_v3, %v1871_v61  ;;  %v1499_v3 = vld [vmem:[#allocation5 + $0x50] sm:$0xff] }
 0x355   :  { %5342 = vst [vmem:[#allocation28_spill] sm:$0xff] %v4361_v63  ;;  %5343 = vst [vmem:[#allocation44_spill] sm:$0xff] %v4363_v38  ;;  %1467 = vrot.lane.b32.xlu1 %v4287_v6, %s3390_s2  ;;  %1469 = vrot.lane.b32.xlu0 %v4296_v4, %s3390_s2  ;;  %v1878_v34 = vand.u32 4294901760, %v4363_v38  ;;  %v1873_v6 = vand.u32 4294901760, %v1872_v54  ;;  %v1490_v4 = vld [vmem:[#allocation5 + $0x8] sm:$0xff] }
 0x356   :  { %v1538_v24 = vsel %vm258_vm0, %v1490_v4, 0 }
 0x357   :  { %v1879_v49 = vsub.f32 %v4363_v38, %v1878_v34  ;;  %v4376_v1 = vpack.c.bf16 %v1878_v34, %v1871_v61  ;;  %v4387_v16 = vand.u32 4294901760, %v1538_v24 }
 0x359   :  { %5344 = vst [vmem:[#allocation45_spill] sm:$0xff] %v4376_v1  ;;  %1471 = vrot.lane.b32.xlu1 %v4310_v47, %s3390_s2  ;;  %1473 = vrot.lane.b32.xlu0 %v1437_v9, %s3390_s2  ;;  %v1880_v15 = vand.u32 4294901760, %v1879_v49  ;;  %v4390_v12 = vsub.f32 %v1538_v24, %v4387_v16  ;;  %v1489_v1 = vld [vmem:[#allocation5] sm:$0xff] }
 0x35b   :  { %v4381_v0 = vpack.c.bf16 %v1880_v15, %v1873_v6  ;;  %5345 = vst [vmem:[#allocation31_spill] sm:$0xff] %v4390_v12  ;;  %v5142_v47 = vand.u32 4294901760, %v4390_v12 }
 0x35d   :  { %1475 = vrot.lane.b32.xlu1 %v1438_v22, %s3390_s2  ;;  %1477 = vrot.lane.b32.xlu0 %v1439_v7, %s3390_s2  ;;  %v1652_v9 = vsub.f32 %v4390_v12, %v5142_v47 }
 0x35f   :  { %v1653_v52 = vand.u32 4294901760, %v1652_v9 }
 0x361   :  { %1479 = vrot.lane.b32.xlu1 %v1440_v17, %s3390_s2  ;;  %1654 = vmatprep.mubr.f32.mxu1 %v1653_v52 }
 0x3a7   :  { %v1442_v22 = vpop.permute.xlu0 %1441 }
 0x3a8   :  { %v1457_v11 = vsel %vm176_vm1, %v1442_v22, 0.0 }
 0x3a9   :  { %v1562_v40 = vand.u32 4294901760, %v1457_v11 }
 0x3ab   :  { %v1444_v36 = vpop.permute.xlu1 %1443  ;;  %v4400_v18 = vsub.f32 %v1457_v11, %v1562_v40 }
 0x3ac   :  { %v1458_v7 = vsel %vm176_vm1, %v1444_v36, 0.0 }
 0x3ad   :  { %v1565_v58 = vand.u32 4294901760, %v1458_v7  ;;  %v5149_v37 = vand.u32 4294901760, %v4400_v18 }
 0x3af   :  { %v4402_v27 = vpack.c.bf16 %v1565_v58, %v1562_v40  ;;  %v4404_v2 = vsub.f32 %v1458_v7, %v1565_v58  ;;  %v1446_v19 = vpop.permute.xlu0 %1445  ;;  %v3392_v7 = vmov 3  }
 0x3b0   :  { %v1459_v20 = vsel %vm176_vm1, %v1446_v19, 0.0  ;;  %3292 = vset.pattern.permute.xlu0 %v3392_v7  ;;  %3293 = vset.pattern.permute.xlu1 %v3392_v7 }
 0x3b1   :  { %5347 = vst [vmem:[#allocation46_spill] sm:$0xff] %v4402_v27  ;;  %v5150_v17 = vand.u32 4294901760, %v4404_v2  ;;  %v1568_v56 = vand.u32 4294901760, %v1459_v20  ;;  %2963 = vmatpush1.bf16.msra.mxu1 %v4402_v27  ;;  %1506 = vperm.xlu0 %3292, %v4128_v31  }
 0x3b2   :  { %2964 = vmatprep.subr.bf16.mxu1 %v5233_v8  ;;  %1510 = vperm.xlu1 %3293, %v4136_v45  }
 0x3b3   :  { %v1448_v10 = vpop.permute.xlu1 %1447  ;;  %v4416_v13 = vpack.c.bf16 %v5150_v17, %v5149_v37  ;;  %v4420_v61 = vsub.f32 %v1459_v20, %v1568_v56  ;;  %v1492_v37 = vld [vmem:[#allocation5 + $0x18] sm:$0xff] }
 0x3b4   :  { %v1460_v57 = vsel %vm176_vm1, %v1448_v10, 0.0  ;;  %v1541_v21 = vsel %vm258_vm0, %v1492_v37, 0 }
 0x3b5   :  { %5348 = vst [vmem:[#allocation33_spill] sm:$0xff] %v4416_v13  ;;  %v1571_v54 = vand.u32 4294901760, %v1460_v57  ;;  %v5147_v4 = vand.u32 4294901760, %v4420_v61  ;;  %1518 = vperm.xlu0 %3292, %v4164_v33   ;;  %v5370_v13 = vand.u32 4294901760, %v4404_v2 }
 0x3b6   :  { %1514 = vperm.xlu1 %3293, %v4146_v42  }
 0x3b7   :  { %v4422_v34 = vpack.c.bf16 %v1571_v54, %v1568_v56  ;;  %v4424_v49 = vsub.f32 %v1460_v57, %v1571_v54  ;;  %v1450_v6 = vpop.permute.xlu0 %1449 }
 0x3b8   :  { %v1461_v15 = vsel %vm176_vm1, %v1450_v6, 0.0 }
 0x3b9   :  { %5349 = vst [vmem:[#allocation49_spill] sm:$0xff] %v4422_v34  ;;  %v5148_v24 = vand.u32 4294901760, %v4424_v49  ;;  %v1574_v9 = vand.u32 4294901760, %v1461_v15  ;;  %2966 = vmatpush1.bf16.msra.mxu1 %v4422_v34  ;;  %1526 = vperm.xlu0 %3292, %v4182_v29  }
 0x3ba   :  { %2967 = vmatprep.subr.bf16.mxu1 %v5233_v8  ;;  %1522 = vperm.xlu1 %3293, %v4154_v50  }
 0x3bb   :  { %v1452_v52 = vpop.permute.xlu1 %1451  ;;  %v4436_v22 = vpack.c.bf16 %v5148_v24, %v5147_v4  ;;  %v4440_v40 = vsub.f32 %v1461_v15, %v1574_v9 }
 0x3bc   :  { %v1462_v11 = vsel %vm176_vm1, %v1452_v52, 0.0 }
 0x3bd   :  { %5350 = vst [vmem:[#allocation11_spill] sm:$0xff] %v4436_v22  ;;  %v1577_v36 = vand.u32 4294901760, %v1462_v11  ;;  %v5145_v10 = vand.u32 4294901760, %v4440_v40  ;;  %1534 = vperm.xlu0 %3292, %v4194_v28   ;;  %v1547_v22 = vsel %vm258_vm0, %v1496_v30, 0 }
 0x3be   :  { %1530 = vperm.xlu1 %3293, %v4172_v39  }
 0x3bf   :  { %v4442_v58 = vpack.c.bf16 %v1577_v36, %v1574_v9  ;;  %v4444_v19 = vsub.f32 %v1462_v11, %v1577_v36  ;;  %v1454_v20 = vpop.permute.xlu0 %1453 }
 0x3c0   :  { %v1463_v56 = vsel %vm176_vm1, %v1454_v20, 0.0 }
 0x3c1   :  { %5351 = vst [vmem:[#allocation13_spill] sm:$0xff] %v4442_v58  ;;  %v5146_v57 = vand.u32 4294901760, %v4444_v19  ;;  %v1580_v54 = vand.u32 4294901760, %v1463_v56  ;;  %2969 = vmatpush1.bf16.msra.mxu1 %v4442_v58  ;;  %v5385_v38 = vand.u32 4294901760, %v4444_v19 }
 0x3c2   :  { %2970 = vmatprep.subr.bf16.mxu1 %v5233_v8 }
 0x3c3   :  { %v1456_v6 = vpop.permute.xlu1 %1455  ;;  %v1466_v15 = vpop.permute.xlu0 %1465  ;;  %v4459_v31 = vpack.c.bf16 %v5146_v57, %v5145_v10  ;;  %v4464_v9 = vsub.f32 %v1463_v56, %v1580_v54 }
 0x3c4   :  { %v1464_v45 = vsel %vm176_vm1, %v1456_v6, 0.0  ;;  %v4468_v11 = vsel %vm201_vm2, %v1466_v15, 0.0 }
 0x3c5   :  { %5352 = vst [vmem:[#allocation18_spill] sm:$0xff] %v4459_v31  ;;  %v1583_v52 = vand.u32 4294901760, %v1464_v45  ;;  %v5143_v42 = vand.u32 4294901760, %v4464_v9  ;;  %v1610_v15 = vand.u32 4294901760, %v4468_v11  ;;  %v1493_v31 = vld [vmem:[#allocation5 + $0x20] sm:$0xff] }
 0x3c6   :  { %v4615_v30 = vand.u32 4294901760, %v1493_v31 }
 0x3c7   :  { %v4470_v36 = vpack.c.bf16 %v1583_v52, %v1580_v54  ;;  %v4472_v33 = vsub.f32 %v1464_v45, %v1583_v52  ;;  %v1468_v7 = vpop.permute.xlu1 %1467  ;;  %v1470_v20 = vpop.permute.xlu0 %1469  ;;  %v4507_v5 = vsub.f32 %v4468_v11, %v1610_v15 }
 0x3c8   :  { %v4477_v6 = vsel %vm201_vm2, %v1468_v7, 0.0  ;;  %v4485_v54 = vsel %vm201_vm2, %v1470_v20, 0.0 }
 0x3c9   :  { %5353 = vst [vmem:[#allocation22_spill] sm:$0xff] %v4470_v36  ;;  %v5144_v56 = vand.u32 4294901760, %v4472_v33  ;;  %2972 = vmatpush1.bf16.msra.mxu1 %v4470_v36  ;;  %v1613_v29 = vand.u32 4294901760, %v4477_v6  ;;  %v5152_v20 = vand.u32 4294901760, %v4485_v54  ;;  %v5374_v36 = vand.u32 4294901760, %v4400_v18 }
 0x3ca   :  { %2973 = vmatprep.subr.bf16.mxu1 %v5233_v8  ;;  %v5388_v14 = vand.u32 4294901760, %v4472_v33 }
 0x3cb   :  { %v1472_v45 = vpop.permute.xlu1 %1471  ;;  %v1474_v52 = vpop.permute.xlu0 %1473  ;;  %v4495_v50 = vpack.c.bf16 %v5144_v56, %v5143_v42  ;;  %v4498_v7 = vsub.f32 %v4477_v6, %v1613_v29  ;;  %v4524_v51 = vsub.f32 %v4485_v54, %v5152_v20  ;;  %v5153_v42 = vand.u32 4294901760, %v4507_v5  ;;  %v1494_v20 = vld [vmem:[#allocation5 + $0x28] sm:$0xff] }
 0x3cc   :  { %v4503_v47 = vsel %vm201_vm2, %v1472_v45, 0.0  ;;  %v4512_v25 = vsel %vm201_vm2, %v1474_v52, 0.0  ;;  %v1774_v58 = vsub.f32 %v4400_v18, %v5374_v36 }
 0x3cd   :  { %5354 = vst [vmem:[#allocation38_spill] sm:$0xff] %v4495_v50  ;;  %v1619_v28 = vand.u32 4294901760, %v4503_v47  ;;  %2975 = vmatpush1.bf16.msra.mxu1 %v4298_v62  ;;  %v5151_v6 = vand.u32 4294901760, %v4512_v25  ;;  %v5154_v45 = vand.u32 4294901760, %v4498_v7  ;;  %v5156_v17 = vand.u32 4294901760, %v4524_v51 }
 0x3ce   :  { %2976 = vmatprep.subr.bf16.mxu1 %v5233_v8  ;;  %v1775_v12 = vand.u32 4294901760, %v1774_v58 }
 0x3cf   :  { %v4519_v26 = vsub.f32 %v4503_v47, %v1619_v28  ;;  %v1476_v39 = vpop.permute.xlu1 %1475  ;;  %v1478_v11 = vpop.permute.xlu0 %1477  ;;  %v4541_v57 = vsub.f32 %v4512_v25, %v5151_v6 }
 0x3d0   :  { %v4528_v52 = vsel %vm201_vm2, %v1476_v39, 0.0  ;;  %v4534_v10 = vsel %vm201_vm2, %v1478_v11, 0.0  ;;  %v4552_v11 = vpack.c.bf16 %v5154_v45, %v5153_v42 }
 0x3d1   :  { %v1625_v56 = vand.u32 4294901760, %v4528_v52  ;;  %2978 = vmatpush1.bf16.msra.mxu1 %v4322_v32  ;;  %v5155_v39 = vand.u32 4294901760, %v4534_v10  ;;  %v5157_v42 = vand.u32 4294901760, %v4541_v57 }
 0x3d2   :  { %2979 = vmatprep.subr.bf16.mxu1 %v5233_v8  ;;  %5355 = vst [vmem:[#allocation42_spill] sm:$0xff] %v4552_v11  ;;  %v4579_v11 = vand.u32 4294901760, %v1489_v1 }
 0x3d3   :  { %v4546_v4 = vsub.f32 %v4528_v52, %v1625_v56  ;;  %v1480_v24 = vpop.permute.xlu1 %1479  ;;  %v4563_v52 = vsub.f32 %v4534_v10, %v5155_v39 }
 0x3d4   :  { %v4557_v6 = vsel %vm201_vm2, %v1480_v24, 0.0  ;;  %v5356_v24 = vand.u32 4294901760, %v4519_v26 }
 0x3d5   :  { %v1631_v47 = vand.u32 4294901760, %v4557_v6  ;;  %2981 = vmatpush1.bf16.msra.mxu1 %v4341_v48  ;;  %v5358_v44 = vand.u32 4294901760, %v4546_v4  ;;  %v5158_v37 = vand.u32 4294901760, %v4563_v52 }
 0x3d6   :  { %2982 = vmatprep.subr.bf16.mxu1 %v5233_v8  ;;  %v4574_v45 = vpack.c.bf16 %v5356_v24, %v5156_v17  ;;  %v4590_v24 = vand.u32 4294901760, %v1541_v21  ;;  %v1544_v17 = vsel %vm258_vm0, %v1494_v20, 0 }
 0x3d7   :  { %v4577_v39 = vsub.f32 %v4557_v6, %v1631_v47  ;;  %v4585_v35 = vpack.c.bf16 %v5358_v44, %v5157_v42  ;;  %v1491_v6 = vld [vmem:[#allocation5 + $0x10] sm:$0xff]  ;;  %v4604_v42 = vsub.f32 %v1489_v1, %v4579_v11 }
 0x3d8   :  { %5357 = vst [vmem:[#allocation47_spill] sm:$0xff] %v4574_v45  ;;  %v4594_v45 = vpack.c.bf16 %v1613_v29, %v1610_v15  ;;  %v4610_v20 = vsub.f32 %v1541_v21, %v4590_v24  ;;  %v4612_v15 = vand.u32 4294901760, %v1544_v17  ;;  %v4617_v29 = vand.u32 4294901760, %v1547_v22 }
 0x3d9   :  { %5359 = vst [vmem:[#allocation48_spill] sm:$0xff] %v4585_v35  ;;  %v5159_v50 = vand.u32 4294901760, %v4577_v39  ;;  %2984 = vmatpush1.bf16.msra.mxu1 %v4361_v63  ;;  %5362 = vst [vmem:[#allocation32_spill] sm:$0xff] %v4604_v42  ;;  %v4606_v35 = vand.u32 4294901760, %v1491_v6  ;;  %v1781_v21 = vsub.f32 %v4404_v2, %v5370_v13 }
 0x3da   :  { %2985 = vmatprep.subr.bf16.mxu1 %v5233_v8  ;;  %5360 = vst [vmem:[#allocation29_spill] sm:$0xff] %v4594_v45  ;;  %5363 = vst [vmem:[#allocation34_spill] sm:$0xff] %v4610_v20  ;;  %v4630_v63 = vsub.f32 %v1544_v17, %v4612_v15  ;;  %v5371_v17 = vand.u32 4294901760, %v4512_v25  ;;  %v5375_v13 = vand.u32 4294901760, %v4610_v20 }
 0x3db   :  { %v4601_v44 = vpack.c.bf16 %v5159_v50, %v5158_v37  ;;  %v1498_v37 = vld [vmem:[#allocation5 + $0x48] sm:$0xff]  ;;  %v5364_v50 = vand.u32 4294901760, %v4485_v54  ;;  %v4635_v54 = vsub.f32 %v1493_v31, %v4615_v30  ;;  %v1782_v36 = vand.u32 4294901760, %v1781_v21 }
 0x3dc   :  { %5367 = vst [vmem:[#allocation21_spill] sm:$0xff] %v4630_v63  ;;  %v1550_v48 = vsel %vm258_vm0, %v1498_v37, 0  ;;  %v5373_v37 = vand.u32 4294901760, %v4604_v42  ;;  %v1667_v25 = vsub.f32 %v4610_v20, %v5375_v13  ;;  %v5377_v13 = vand.u32 4294901760, %v4534_v10 }
 0x3dd   :  { %5361 = vst [vmem:[#allocation30_spill] sm:$0xff] %v4601_v44  ;;  %2987 = vmatpush1.bf16.msra.mxu1 %v4594_v45  ;;  %v4621_v1 = vpack.c.bf16 %v1619_v28, %v5364_v50  ;;  %v1495_v44 = vld [vmem:[#allocation5 + $0x30] sm:$0xff]  ;;  %v4625_v45 = vsub.f32 %v1491_v6, %v4606_v35  ;;  %5368 = vst [vmem:[#allocation24_spill] sm:$0xff] %v4635_v54  ;;  %v4638_v50 = vsub.f32 %v1547_v22, %v4617_v29  ;;  %v1500_v6 = vld [vmem:[#allocation5 + $0x58] sm:$0xff] }
 0x3de   :  { %2988 = vmatprep.subr.bf16.mxu1 %v5233_v8  ;;  %v4640_v28 = vand.u32 4294901760, %v1495_v44  ;;  %v1658_v32 = vsub.f32 %v4604_v42, %v5373_v37  ;;  %v4653_v62 = vand.u32 4294901760, %v1550_v48  ;;  %v1497_v22 = vld [vmem:[#allocation5 + $0x40] sm:$0xff]  ;;  %v4675_v20 = vpack.c.bf16 %v1631_v47, %v5377_v13 }
 0x3df   :  { %5365 = vst [vmem:[#allocation15_spill] sm:$0xff] %v4621_v1  ;;  %5366 = vst [vmem:[#allocation16_spill] sm:$0xff] %v4625_v45  ;;  %v5379_v37 = vand.u32 4294901760, %v4625_v45  ;;  %v1668_v47 = vand.u32 4294901760, %v1667_v25  ;;  %v5382_v13 = vand.u32 4294901760, %v4630_v63  ;;  %v5384_v58 = vand.u32 4294901760, %v4638_v50 }
 0x3e0   :  { %5369 = vst [vmem:[#allocation35_spill] sm:$0xff] %v4638_v50  ;;  %v4668_v34 = vsub.f32 %v1495_v44, %v4640_v28  ;;  %5378 = vst [vmem:[#allocation37_spill] sm:$0xff] %v4675_v20  ;;  %v1659_v42 = vand.u32 4294901760, %v1658_v32  ;;  %v4683_v44 = vsub.f32 %v1550_v48, %v4653_v62  ;;  %v5383_v48 = vand.u32 4294901760, %v4635_v54 }
 0x3e1   :  { %2990 = vmatpush1.bf16.msra.mxu1 %v4621_v1  ;;  %v4647_v1 = vpack.c.bf16 %v1625_v56, %v5371_v17  ;;  %v1553_v17 = vsel %vm258_vm0, %v1500_v6, 0  ;;  %v4677_v56 = vand.u32 4294901760, %v1497_v22  ;;  %v1502_v6 = vld [vmem:[#allocation5 + $0x68] sm:$0xff]  ;;  %v1673_v31 = vsub.f32 %v4625_v45, %v5379_v37 }
 0x3e2   :  { %2991 = vmatprep.subr.bf16.mxu1 %v5233_v8  ;;  %5380 = vst [vmem:[#allocation39_spill] sm:$0xff] %v4683_v44  ;;  %v4685_v21 = vand.u32 4294901760, %v1553_v17  ;;  %v1682_v32 = vsub.f32 %v4630_v63, %v5382_v13  ;;  %v1688_v37 = vsub.f32 %v4635_v54, %v5383_v48  ;;  %v1697_v45 = vsub.f32 %v4638_v50, %v5384_v58 }
 0x3e3   :  { %5372 = vst [vmem:[#allocation36_spill] sm:$0xff] %v4647_v1  ;;  %v1809_v13 = vsub.f32 %v4444_v19, %v5385_v38  ;;  %v2998_v63 = vpack.c.bf16 %v1782_v36, %v1775_v12  ;;  %v4707_v23 = vsub.f32 %v1497_v22, %v4677_v56  ;;  %v1674_v48 = vand.u32 4294901760, %v1673_v31  ;;  %v1501_v22 = vld [vmem:[#allocation5 + $0x60] sm:$0xff] }
 0x3e4   :  { %v4711_v58 = vsub.f32 %v1553_v17, %v4685_v21  ;;  %v1683_v38 = vand.u32 4294901760, %v1682_v32  ;;  %v1698_v31 = vand.u32 4294901760, %v1697_v45  ;;  %v5387_v17 = vand.u32 4294901760, %v4668_v34 }
 0x3e5   :  { %2993 = vmatpush1.bf16.msra.mxu1 %v4647_v1  ;;  %v5376_v1 = vand.u32 4294901760, %v4424_v49  ;;  %v1810_v54 = vand.u32 4294901760, %v1809_v13  ;;  %v1717_v32 = vand.u32 4294901760, %v4707_v23  ;;  %v5390_v13 = vand.u32 4294901760, %v4464_v9 }
 0x3e6   :  { %2994 = vmatprep.subr.bf16.mxu1 %v5233_v8  ;;  %v1703_v36 = vsub.f32 %v4668_v34, %v5387_v17  ;;  %v4736_v17 = vand.u32 4294901760, %v1501_v22 }
 0x3e7   :  { %v1795_v27 = vsub.f32 %v4424_v49, %v5376_v1  ;;  %v5381_v1 = vand.u32 4294901760, %v4420_v61 }
 0x3e8   :  { %v1704_v45 = vand.u32 4294901760, %v1703_v36 }
 0x3e9   :  { %v1788_v10 = vsub.f32 %v4420_v61, %v5381_v1  ;;  %2996 = vmatpush1.bf16.msra.mxu1 %v4675_v20  ;;  %v1556_v20 = vsel %vm258_vm0, %v1502_v6, 0  ;;  %v1796_v25 = vand.u32 4294901760, %v1795_v27  ;;  %v4713_v1 = vand.u32 4294901760, %v1499_v3 }
 0x3ea   :  { %2997 = vmatprep.subr.bf16.mxu1 %v5233_v8  ;;  %v5386_v27 = vand.u32 4294901760, %v4440_v40  ;;  %v4718_v12 = vand.u32 4294901760, %v1556_v20 }
 0x3eb   :  { %v1789_v6 = vand.u32 4294901760, %v1788_v10  ;;  %v1559_v10 = vsel %vm258_vm0, %v1504_v43, 0  ;;  %v4734_v60 = vsub.f32 %v1499_v3, %v4713_v1 }
 0x3ec   :  { %1660 = vmatmul.mubr.f32.vlgmr.msra.gmra.mrb[0].mxu1 %v1659_v42  ;;  %v1802_v50 = vsub.f32 %v4440_v40, %v5386_v27  ;;  %v1689_v42 = vand.u32 4294901760, %v1688_v37  ;;  %v5389_v27 = vand.u32 4294901760, %v4683_v44 }
 0x3ed   :  { %2999 = vmatpush1.bf16.msra.mxu1 %v2998_v63  ;;  %1669 = vmatprep.mubr.f32.mxu1 %v1668_v47  ;;  %v1823_v63 = vsub.f32 %v4472_v33, %v5388_v14  ;;  %v3001_v47 = vpack.c.bf16 %v1796_v25, %v1789_v6  ;;  %v1816_v14 = vsub.f32 %v4464_v9, %v5390_v13  ;;  %v1503_v6 = vld [vmem:[#allocation5 + $0x70] sm:$0xff] }
 0x3ee   :  { %3000 = vmatprep.subr.bf16.mxu1 %v5233_v8  ;;  %v1712_v37 = vsub.f32 %v4683_v44, %v5389_v27  ;;  %v1803_v43 = vand.u32 4294901760, %v1802_v50  ;;  %v4742_v25 = vsub.f32 %v1556_v20, %v4718_v12  ;;  %v1718_v50 = vsub.f32 %v4707_v23, %v1717_v32 }
 0x3ef   :  { %v1824_v27 = vand.u32 4294901760, %v1823_v63  ;;  %v4754_v20 = vand.u32 4294901760, %v1503_v6  ;;  %v1817_v13 = vand.u32 4294901760, %v1816_v14  ;;  %v5391_v63 = vand.u32 4294901760, %v4711_v58 }
 0x3f0   :  { %1675 = vmatmul.mubr.f32.gmra.mrb[2].mxu1 %v1674_v48  ;;  %v4744_v48 = vand.u32 4294901760, %v1559_v10  ;;  %v3004_v3 = vpack.c.bf16 %v1810_v54, %v1803_v43  ;;  %v1713_v44 = vand.u32 4294901760, %v1712_v37  ;;  %v1741_v36 = vand.u32 4294901760, %v4742_v25 }
 0x3f1   :  { %3002 = vmatpush1.bf16.msra.mxu1 %v3001_v47  ;;  %1684 = vmatprep.mubr.f32.mxu1 %v1683_v38  ;;  %v1732_v47 = vand.u32 4294901760, %v4734_v60  ;;  %v4752_v38 = vsub.f32 %v1501_v22, %v4736_v17  ;;  %v1727_v54 = vsub.f32 %v4711_v58, %v5391_v63  ;;  %v1719_v22 = vand.u32 4294901760, %v1718_v50 }
 0x3f2   :  { %3003 = vmatprep.subr.bf16.mxu1 %v5233_v8  ;;  %v4761_v43 = vsub.f32 %v1559_v10, %v4744_v48  ;;  %v4769_v14 = vsub.f32 %v1503_v6, %v4754_v20  ;;  %v1742_v10 = vsub.f32 %v4742_v25, %v1741_v36 }
 0x3f3   :  { %v1733_v37 = vsub.f32 %v4734_v60, %v1732_v47 }
 0x3f4   :  { %1690 = vmatmul.mubr.f32.gmra.mrb[4].mxu1 %v1689_v42  ;;  %v3007_v42 = vpack.c.bf16 %v1824_v27, %v1817_v13  ;;  %v1756_v27 = vand.u32 4294901760, %v4761_v43  ;;  %v5206_v6 = vand.u32 4294901760, %v4769_v14 }
 0x3f5   :  { %3005 = vmatpush1.bf16.msra.mxu1 %v3004_v3  ;;  %1699 = vmatprep.mubr.f32.mxu1 %v1698_v31  ;;  %v1747_v31 = vand.u32 4294901760, %v4752_v38  ;;  %v1728_v3 = vand.u32 4294901760, %v1727_v54 }
 0x3f6   :  { %3006 = vmatprep.subr.bf16.mxu1 %v5233_v8  ;;  %v1757_v13 = vsub.f32 %v4761_v43, %v1756_v27  ;;  %v1763_v54 = vsub.f32 %v4769_v14, %v5206_v6  ;;  %v5399_v6 = vand.u32 4294901760, %v4563_v52 }
 0x3f7   :  { %v1748_v50 = vsub.f32 %v4752_v38, %v1747_v31 }
 0x3f8   :  { %1705 = vmatmul.mubr.f32.gmra.mrb[6].mxu1 %v1704_v45  ;;  %v1734_v45 = vand.u32 4294901760, %v1733_v37  ;;  %v1764_v37 = vand.u32 4294901760, %v1763_v54  ;;  %v5396_v54 = vand.u32 4294901760, %v4546_v4 }
 0x3f9   :  { %3008 = vmatpush1.bf16.msra.mxu1 %v3007_v42  ;;  %1714 = vmatprep.mubr.f32.mxu1 %v1713_v44  ;;  %v1743_v44 = vand.u32 4294901760, %v1742_v10  ;;  %v1749_v63 = vand.u32 4294901760, %v1748_v50  ;;  %v1758_v42 = vand.u32 4294901760, %v1757_v13  ;;  %v5395_v13 = vand.u32 4294901760, %v4524_v51 }
 0x3fa   :  { %3009 = vmatprep.subr.bf16.mxu1 %v5233_v8 }
 0x3fc   :  { %1720 = vmatmul.mubr.f32.gmra.mrb[8].mxu1 %v1719_v22 }
 0x3fd   :  { %3011 = vmatpush1.bf16.msra.mxu1 %v4327_v46  ;;  %1729 = vmatprep.mubr.f32.mxu1 %v1728_v3  ;;  %v5392_v46 = vand.u32 4294901760, %v4498_v7  ;;  %v5393_v3 = vand.u32 4294901760, %v4507_v5 }
 0x3fe   :  { %3012 = vmatprep.subr.bf16.mxu1 %v5233_v8 }
 0x3ff   :  { %v1893_v22 = vsub.f32 %v4498_v7, %v5392_v46  ;;  %v1886_v10 = vsub.f32 %v4507_v5, %v5393_v3 }
 0x400   :  { %1735 = vmatmul.mubr.f32.gmra.mrb[10].mxu1 %v1734_v45  ;;  %v5394_v45 = vand.u32 4294901760, %v4519_v26 }
 0x401   :  { %3014 = vmatpush1.bf16.msra.mxu1 %v4345_v53  ;;  %1744 = vmatprep.mubr.f32.mxu1 %v1743_v44  ;;  %v1894_v53 = vand.u32 4294901760, %v1893_v22  ;;  %v1887_v44 = vand.u32 4294901760, %v1886_v10 }
 0x402   :  { %3015 = vmatprep.subr.bf16.mxu1 %v5233_v8  ;;  %v1907_v50 = vsub.f32 %v4519_v26, %v5394_v45 }
 0x403   :  { %v3022_v46 = vpack.c.bf16 %v1894_v53, %v1887_v44 }
 0x404   :  { %1750 = vmatmul.mubr.f32.gmra.mrb[12].mxu1 %v1749_v63  ;;  %v1900_v63 = vsub.f32 %v4524_v51, %v5395_v13 }
 0x405   :  { %3017 = vmatpush1.bf16.msra.mxu1 %v4365_v59  ;;  %1759 = vmatprep.mubr.f32.mxu1 %v1758_v42  ;;  %v1908_v59 = vand.u32 4294901760, %v1907_v50  ;;  %v1921_v42 = vsub.f32 %v4546_v4, %v5396_v54  ;;  %v1928_v54 = vsub.f32 %v4563_v52, %v5399_v6  ;;  %v3037_v6 = vpack.c.bf16 %v4424_v49, %v4420_v61  ;;  %v5401_v49 = vld [vmem:[#allocation23_spill] sm:$0xff] }
 0x406   :  { %3018 = vmatprep.subr.bf16.mxu1 %v5233_v8  ;;  %v1901_v22 = vand.u32 4294901760, %v1900_v63  ;;  %v5400_v61 = vpack.c.bf16 %v4301_v55, %v4290_v41  ;;  %v5407_v55 = vld [vmem:[#allocation44_spill] sm:$0xff] }
 0x407   :  { %v1922_v10 = vand.u32 4294901760, %v1921_v42  ;;  %v1929_v63 = vand.u32 4294901760, %v1928_v54  ;;  %v5421_v54 = vld [vmem:[#allocation39_spill] sm:$0xff] }
 0x408   :  { %1765 = vmatmul.mubr.f32.gmra.mrb[14].mxu1 %v1764_v37  ;;  %v5397_v37 = vand.u32 4294901760, %v4541_v57  ;;  %v3025_v13 = vpack.c.bf16 %v1908_v59, %v1901_v22  ;;  %v3034_v59 = vpack.c.bf16 %v4404_v2, %v4400_v18  ;;  %v3040_v18 = vpack.c.bf16 %v4444_v19, %v4440_v40  ;;  %v5402_v40 = vld [vmem:[#allocation14_spill] sm:$0xff] }
 0x409   :  { %3020 = vmatpush1.bf16.msra.mxu1 %v4381_v0  ;;  %1955 = vmatprep.mubr.f32.mxu1 %v4387_v16  ;;  %v5398_v0 = vand.u32 4294901760, %v4577_v39  ;;  %v3043_v2 = vpack.c.bf16 %v4472_v33, %v4464_v9  ;;  %v5403_v19 = vpack.c.bf16 %v5401_v49, %v5402_v40  ;;  %v5404_v9 = vld [vmem:[#allocation27_spill] sm:$0xff]  ;;  %v5405_v33 = vld [vmem:[#allocation20_spill] sm:$0xff]  ;;  %v5432_v40 = vld [vmem:[#allocation33_spill] sm:$0xff] }
 0x40a   :  { %3021 = vmatprep.subr.bf16.mxu1 %v5233_v8  ;;  %v1914_v3 = vsub.f32 %v4541_v57, %v5397_v37  ;;  %v5406_v41 = vpack.c.bf16 %v5404_v9, %v5405_v33  ;;  %v5410_v37 = vld [vmem:[#allocation31_spill] sm:$0xff] }
 0x40b   :  { %v1935_v45 = vsub.f32 %v4577_v39, %v5398_v0  ;;  %v3064_v0 = vpack.c.bf16 %v4546_v4, %v4541_v57  ;;  %v5415_v4 = vld [vmem:[#allocation49_spill] sm:$0xff]  ;;  %v5435_v33 = vld [vmem:[#allocation11_spill] sm:$0xff] }
 0x40c   :  { %v1915_v50 = vand.u32 4294901760, %v1914_v3  ;;  %v3058_v3 = vpack.c.bf16 %v4498_v7, %v4507_v5  ;;  %v5411_v5 = vld [vmem:[#allocation32_spill] sm:$0xff]  ;;  %v5412_v7 = vld [vmem:[#allocation46_spill] sm:$0xff]  ;;  %v5416_v57 = vld [vmem:[#allocation21_spill] sm:$0xff] }
 0x40d   :  { %3023 = vmatpush1.bf16.msra.mxu1 %v3022_v46  ;;  %v1936_v53 = vand.u32 4294901760, %v1935_v45  ;;  %v5408_v46 = vld [vmem:[#allocation41_spill] sm:$0xff]  ;;  %v3067_v45 = vpack.c.bf16 %v4577_v39, %v4563_v52  ;;  %v5417_v39 = vld [vmem:[#allocation24_spill] sm:$0xff]  ;;  %v5431_v49 = vand.u32 4294901760, %v5411_v5 }
 0x40e   :  { %3024 = vmatprep.subr.bf16.mxu1 %v5233_v8  ;;  %v3028_v44 = vpack.c.bf16 %v1922_v10, %v1915_v50  ;;  %v5409_v22 = vpack.c.bf16 %v5407_v55, %v5408_v46  ;;  %v3061_v10 = vpack.c.bf16 %v4519_v26, %v4524_v51  ;;  %v5413_v51 = vld [vmem:[#allocation34_spill] sm:$0xff]  ;;  %v5414_v26 = vld [vmem:[#allocation16_spill] sm:$0xff]  ;;  %v5418_v52 = vld [vmem:[#allocation13_spill] sm:$0xff]  ;;  %v5437_v55 = vand.u32 4294901760, %v5417_v39 }
 0x40f   :  { %v3031_v42 = vpack.c.bf16 %v1936_v53, %v1929_v63  ;;  %v5420_v50 = vld [vmem:[#allocation22_spill] sm:$0xff]  ;;  %v5422_v53 = vld [vmem:[#allocation12_spill] sm:$0xff]  ;;  %v5434_v9 = vand.u32 4294901760, %v5414_v26 }
 0x410   :  { %v5424_v63 = vld [vmem:[#allocation40_spill] sm:$0xff]  ;;  %v5438_v46 = vld [vmem:[#allocation18_spill] sm:$0xff] }
 0x411   :  { %3026 = vmatpush1.bf16.msra.mxu1 %v3025_v13  ;;  %v5419_v13 = vld [vmem:[#allocation35_spill] sm:$0xff] }
 0x412   :  { %3027 = vmatprep.subr.bf16.mxu1 %v5233_v8 }
 0x415   :  { %3029 = vmatpush1.bf16.msra.mxu1 %v3028_v44  ;;  %v5423_v44 = vld [vmem:[#allocation17_spill] sm:$0xff] }
 0x416   :  { %3030 = vmatprep.subr.bf16.mxu1 %v5233_v8 }
 0x419   :  { %3032 = vmatpush1.bf16.msra.mxu1 %v3031_v42  ;;  %v5425_v42 = vld [vmem:[#allocation28_spill] sm:$0xff] }
 0x41a   :  { %3033 = vmatprep.subr.bf16.mxu1 %v5233_v8 }
 0x41c   :  { %1957 = vmatmul.mubr.f32.vlgmr.msra.gmra.mrb[16].mxu1 %v4579_v11 }
 0x41d   :  { %3035 = vmatpush1.bf16.msra.mxu1 %v3034_v59  ;;  %1962 = vmatprep.mubr.f32.mxu1 %v4590_v24  ;;  %v5426_v59 = vand.u32 4294901760, %v5410_v37 }
 0x41e   :  { %3036 = vmatprep.subr.bf16.mxu1 %v5233_v8 }
 0x420   :  { %1964 = vmatmul.mubr.f32.gmra.mrb[18].mxu1 %v4606_v35 }
 0x421   :  { %3038 = vmatpush1.bf16.msra.mxu1 %v3037_v6  ;;  %1969 = vmatprep.mubr.f32.mxu1 %v4612_v15  ;;  %v5427_v6 = vld [vmem:[#allocation29_spill] sm:$0xff] }
 0x422   :  { %3039 = vmatprep.subr.bf16.mxu1 %v5233_v8 }
 0x424   :  { %1971 = vmatmul.mubr.f32.gmra.mrb[20].mxu1 %v4615_v30 }
 0x425   :  { %3041 = vmatpush1.bf16.msra.mxu1 %v3040_v18  ;;  %1976 = vmatprep.mubr.f32.mxu1 %v4617_v29  ;;  %v5428_v18 = vld [vmem:[#allocation15_spill] sm:$0xff] }
 0x426   :  { %3042 = vmatprep.subr.bf16.mxu1 %v5233_v8 }
 0x428   :  { %1978 = vmatmul.mubr.f32.gmra.mrb[22].mxu1 %v4640_v28 }
 0x429   :  { %3044 = vmatpush1.bf16.msra.mxu1 %v3043_v2  ;;  %1983 = vmatprep.mubr.f32.mxu1 %v4653_v62  ;;  %v5429_v2 = vld [vmem:[#allocation36_spill] sm:$0xff] }
 0x42a   :  { %3045 = vmatprep.subr.bf16.mxu1 %v5233_v8 }
 0x42c   :  { %1985 = vmatmul.mubr.f32.gmra.mrb[24].mxu1 %v4677_v56 }
 0x42d   :  { %3047 = vmatpush1.bf16.msra.mxu1 %v5400_v61  ;;  %1990 = vmatprep.mubr.f32.mxu1 %v4685_v21  ;;  %v5430_v61 = vld [vmem:[#allocation37_spill] sm:$0xff] }
 0x42e   :  { %3048 = vmatprep.subr.bf16.mxu1 %v5233_v8 }
 0x430   :  { %1992 = vmatmul.mubr.f32.gmra.mrb[26].mxu1 %v4713_v1 }
 0x431   :  { %3050 = vmatpush1.bf16.msra.mxu1 %v5403_v19  ;;  %1997 = vmatprep.mubr.f32.mxu1 %v4718_v12  ;;  %v5433_v19 = vand.u32 4294901760, %v5413_v51 }
 0x432   :  { %3051 = vmatprep.subr.bf16.mxu1 %v5233_v8 }
 0x434   :  { %1999 = vmatmul.mubr.f32.gmra.mrb[28].mxu1 %v4736_v17 }
 0x435   :  { %3053 = vmatpush1.bf16.msra.mxu1 %v5406_v41  ;;  %2004 = vmatprep.mubr.f32.mxu1 %v4744_v48  ;;  %v5436_v41 = vand.u32 4294901760, %v5416_v57 }
 0x436   :  { %3054 = vmatprep.subr.bf16.mxu1 %v5233_v8 }
 0x438   :  { %2006 = vmatmul.mubr.f32.gmra.mrb[30].mxu1 %v4754_v20 }
 0x439   :  { %3056 = vmatpush1.bf16.msra.mxu1 %v5409_v22  ;;  %2125 = vmatprep.mubr.f32.mxu1 %v5410_v37  ;;  %v5439_v22 = vand.u32 4294901760, %v5419_v13  ;;  %v5440_v37 = vand.u32 4294901760, %v4668_v34 }
 0x43a   :  { %3057 = vmatprep.subr.bf16.mxu1 %v5233_v8 }
 0x43d   :  { %3059 = vmatpush1.bf16.msra.mxu1 %v3058_v3  ;;  %v5441_v3 = vld [vmem:[#allocation38_spill] sm:$0xff] }
 0x43e   :  { %3060 = vmatprep.subr.bf16.mxu1 %v5233_v8 }
 0x441   :  { %3062 = vmatpush1.bf16.msra.mxu1 %v3061_v10  ;;  %v5442_v10 = vand.u32 4294901760, %v5421_v54 }
 0x442   :  { %3063 = vmatprep.subr.bf16.mxu1 %v5233_v8 }
 0x445   :  { %3065 = vmatpush1.bf16.msra.mxu1 %v3064_v0  ;;  %v5443_v0 = vld [vmem:[#allocation19_spill] sm:$0xff] }
 0x446   :  { %3066 = vmatprep.subr.bf16.mxu1 %v5233_v8 }
 0x449   :  { %3068 = vmatpush1.bf16.msra.mxu1 %v3067_v45  ;;  %v5444_v45 = vand.u32 4294901760, %v4711_v58 }
 0x44a   :  { %3069 = vmatprep.subr.bf16.mxu1 %v5233_v8 }
 0x44c   :  { %2128 = vmatmul.mubr.f32.vlgmr.msra.gmra.mrb[32].mxu1 %v5411_v5 }
 0x44d   :  { %3071 = vmatpush1.bf16.msra.mxu1 %v5412_v7  ;;  %2134 = vmatprep.mubr.f32.mxu1 %v5413_v51 }
 0x44e   :  { %3072 = vmatprep.subr.bf16.mxu1 %v5233_v8 }
 0x450   :  { %2137 = vmatmul.mubr.f32.gmra.mrb[34].mxu1 %v5414_v26 }
 0x451   :  { %3074 = vmatpush1.bf16.msra.mxu1 %v5415_v4  ;;  %2143 = vmatprep.mubr.f32.mxu1 %v5416_v57 }
 0x452   :  { %3075 = vmatprep.subr.bf16.mxu1 %v5233_v8 }
 0x454   :  { %2146 = vmatmul.mubr.f32.gmra.mrb[36].mxu1 %v5417_v39 }
 0x455   :  { %3077 = vmatpush1.bf16.msra.mxu1 %v5418_v52  ;;  %2152 = vmatprep.mubr.f32.mxu1 %v5419_v13 }
 0x456   :  { %3078 = vmatprep.subr.bf16.mxu1 %v5233_v8 }
 0x458   :  { %2155 = vmatmul.mubr.f32.gmra.mrb[38].mxu1 %v4668_v34  ;;  %v5445_v34 = vld [vmem:[#allocation25_spill] sm:$0xff] }
 0x459   :  { %3080 = vmatpush1.bf16.msra.mxu1 %v5420_v50  ;;  %2161 = vmatprep.mubr.f32.mxu1 %v5421_v54  ;;  %v1511_v54 = vpop.permute.xlu1 %1510 }
 0x45a   :  { %3081 = vmatprep.subr.bf16.mxu1 %v5233_v8 }
 0x45c   :  { %2164 = vmatmul.mubr.f32.gmra.mrb[40].mxu1 %v4707_v23  ;;  %v5446_v23 = vld [vmem:[#allocation43_spill] sm:$0xff] }
 0x45d   :  { %3083 = vmatpush1.bf16.msra.mxu1 %v5422_v53  ;;  %2170 = vmatprep.mubr.f32.mxu1 %v4711_v58  ;;  %v5448_v58 = vld [vmem:[#allocation45_spill] sm:$0xff] }
 0x45e   :  { %3084 = vmatprep.subr.bf16.mxu1 %v5233_v8 }
 0x460   :  { %2173 = vmatmul.mubr.f32.gmra.mrb[42].mxu1 %v4734_v60  ;;  %v5447_v60 = vand.u32 4294901760, %v4769_v14 }
 0x461   :  { %3086 = vmatpush1.bf16.msra.mxu1 %v5423_v44  ;;  %2179 = vmatprep.mubr.f32.mxu1 %v4742_v25  ;;  %v5450_v25 = vld [vmem:[#allocation47_spill] sm:$0xff] }
 0x462   :  { %3087 = vmatprep.subr.bf16.mxu1 %v5233_v8 }
 0x464   :  { %2182 = vmatmul.mubr.f32.gmra.mrb[44].mxu1 %v4752_v38  ;;  %v5452_v38 = vld [vmem:[#allocation30_spill] sm:$0xff] }
 0x465   :  { %3089 = vmatpush1.bf16.msra.mxu1 %v5424_v63  ;;  %2188 = vmatprep.mubr.f32.mxu1 %v4761_v43 }
 0x466   :  { %3090 = vmatprep.subr.bf16.mxu1 %v5233_v8 }
 0x468   :  { %2191 = vmatmul.mubr.f32.gmra.mrb[46].mxu1 %v4769_v14 }
 0x469   :  { %3092 = vmatpush1.bf16.msra.mxu1 %v5425_v42  ;;  %2287 = vmatprep.mubr.f32.mxu1 %v5426_v59 }
 0x46a   :  { %3093 = vmatprep.subr.bf16.mxu1 %v5233_v8 }
 0x46d   :  { %3095 = vmatpush1.bf16.msra.mxu1 %v5427_v6 }
 0x46e   :  { %3096 = vmatprep.subr.bf16.mxu1 %v5233_v8 }
 0x471   :  { %3098 = vmatpush1.bf16.msra.mxu1 %v5428_v18 }
 0x472   :  { %3099 = vmatprep.subr.bf16.mxu1 %v5233_v8 }
 0x475   :  { %3101 = vmatpush1.bf16.msra.mxu1 %v5429_v2 }
 0x476   :  { %3102 = vmatprep.subr.bf16.mxu1 %v5233_v8 }
 0x479   :  { %3104 = vmatpush1.bf16.msra.mxu1 %v5430_v61 }
 0x47a   :  { %3105 = vmatprep.subr.bf16.mxu1 %v5233_v8 }
 0x47c   :  { %2291 = vmatmul.mubr.f32.vlgmr.msra.gmra.mrb[48].mxu1 %v5431_v49 }
 0x47d   :  { %3107 = vmatpush1.bf16.msra.mxu1 %v5432_v40  ;;  %2298 = vmatprep.mubr.f32.mxu1 %v5433_v19 }
 0x47e   :  { %3108 = vmatprep.subr.bf16.mxu1 %v5233_v8 }
 0x480   :  { %2302 = vmatmul.mubr.f32.gmra.mrb[50].mxu1 %v5434_v9 }
 0x481   :  { %3110 = vmatpush1.bf16.msra.mxu1 %v5435_v33  ;;  %2309 = vmatprep.mubr.f32.mxu1 %v5436_v41 }
 0x482   :  { %3111 = vmatprep.subr.bf16.mxu1 %v5233_v8 }
 0x484   :  { %2313 = vmatmul.mubr.f32.gmra.mrb[52].mxu1 %v5437_v55 }
 0x485   :  { %3113 = vmatpush1.bf16.msra.mxu1 %v5438_v46  ;;  %2320 = vmatprep.mubr.f32.mxu1 %v5439_v22 }
 0x486   :  { %3114 = vmatprep.subr.bf16.mxu1 %v5233_v8 }
 0x488   :  { %2324 = vmatmul.mubr.f32.gmra.mrb[54].mxu1 %v5440_v37 }
 0x489   :  { %3116 = vmatpush1.bf16.msra.mxu1 %v5441_v3  ;;  %2331 = vmatprep.mubr.f32.mxu1 %v5442_v10 }
 0x48a   :  { %3117 = vmatprep.subr.bf16.mxu1 %v5233_v8 }
 0x48c   :  { %2335 = vmatmul.mubr.f32.gmra.mrb[56].mxu1 %v1717_v32  ;;  %v5449_v32 = vld [vmem:[#allocation42_spill] sm:$0xff] }
 0x48d   :  { %3119 = vmatpush1.bf16.msra.mxu1 %v5443_v0  ;;  %2342 = vmatprep.mubr.f32.mxu1 %v5444_v45 }
 0x48e   :  { %3120 = vmatprep.subr.bf16.mxu1 %v5233_v8 }
 0x490   :  { %2346 = vmatmul.mubr.f32.gmra.mrb[58].mxu1 %v1732_v47  ;;  %v5451_v47 = vld [vmem:[#allocation48_spill] sm:$0xff] }
 0x491   :  { %3122 = vmatpush1.bf16.msra.mxu1 %v5445_v34  ;;  %2353 = vmatprep.mubr.f32.mxu1 %v1741_v36 }
 0x492   :  { %3123 = vmatprep.subr.bf16.mxu1 %v5233_v8 }
 0x494   :  { %2357 = vmatmul.mubr.f32.gmra.mrb[60].mxu1 %v1747_v31 }
 0x495   :  { %3125 = vmatpush1.bf16.msra.mxu1 %v5446_v23  ;;  %2364 = vmatprep.mubr.f32.mxu1 %v1756_v27 }
 0x496   :  { %3126 = vmatprep.subr.bf16.mxu1 %v5233_v8 }
 0x498   :  { %2368 = vmatmul.mubr.f32.gmra.mrb[62].mxu1 %v5447_v60 }
 0x499   :  { %3128 = vmatpush1.bf16.msra.mxu1 %v5448_v58  ;;  %2510 = vmatprep.mubr.f32.mxu1 %v4387_v16 }
 0x49a   :  { %3129 = vmatprep.subr.bf16.mxu1 %v5233_v8 }
 0x49d   :  { %3131 = vmatpush1.bf16.msra.mxu1 %v5449_v32 }
 0x49e   :  { %3132 = vmatprep.subr.bf16.mxu1 %v5233_v8 }
 0x4a1   :  { %3134 = vmatpush1.bf16.msra.mxu1 %v5450_v25 }
 0x4a2   :  { %3135 = vmatprep.subr.bf16.mxu1 %v5233_v8 }
 0x4a5   :  { %3137 = vmatpush1.bf16.msra.mxu1 %v5451_v47 }
 0x4a6   :  { %3138 = vmatprep.subr.bf16.mxu1 %v5233_v8 }
 0x4a9   :  { %3140 = vmatpush1.bf16.msra.mxu1 %v5452_v38 }
 0x4aa   :  { %3141 = vmatprep.subr.bf16.mxu1 %v5233_v8 }
 0x4ac   :  { %2512 = vmatmul.mubr.f32.vlgmr.msra.gmra.mrb[64].mxu1 %v4579_v11 }
 0x4ad   :  { %3143 = vmatpush1.bf16.msra.mxu1 %v5412_v7  ;;  %2517 = vmatprep.mubr.f32.mxu1 %v4590_v24 }
 0x4ae   :  { %3144 = vmatprep.subr.bf16.mxu1 %v5233_v8 }
 0x4b0   :  { %2519 = vmatmul.mubr.f32.gmra.mrb[66].mxu1 %v4606_v35 }
 0x4b1   :  { %3146 = vmatpush1.bf16.msra.mxu1 %v5415_v4  ;;  %2524 = vmatprep.mubr.f32.mxu1 %v4612_v15 }
 0x4b2   :  { %3147 = vmatprep.subr.bf16.mxu1 %v5233_v8 }
 0x4b4   :  { %2526 = vmatmul.mubr.f32.gmra.mrb[68].mxu1 %v4615_v30 }
 0x4b5   :  { %3149 = vmatpush1.bf16.msra.mxu1 %v5418_v52  ;;  %2531 = vmatprep.mubr.f32.mxu1 %v4617_v29 }
 0x4b6   :  { %3150 = vmatprep.subr.bf16.mxu1 %v5233_v8 }
 0x4b8   :  { %2533 = vmatmul.mubr.f32.gmra.mrb[70].mxu1 %v4640_v28 }
 0x4b9   :  { %3152 = vmatpush1.bf16.msra.mxu1 %v5420_v50  ;;  %2538 = vmatprep.mubr.f32.mxu1 %v4653_v62 }
 0x4ba   :  { %3153 = vmatprep.subr.bf16.mxu1 %v5233_v8 }
 0x4bc   :  { %2540 = vmatmul.mubr.f32.gmra.mrb[72].mxu1 %v4677_v56 }
 0x4bd   :  { %3155 = vmatpush1.bf16.msra.mxu1 %v5422_v53  ;;  %2545 = vmatprep.mubr.f32.mxu1 %v4685_v21 }
 0x4be   :  { %3156 = vmatprep.subr.bf16.mxu1 %v5233_v8 }
 0x4bf   :  { %v1661_v36 = vpop.f32.mrb[0].mxu1 }
 0x4c0   :  { %v1663_v43 = vpop.f32.mrb[1].mxu1  ;;  %2547 = vmatmul.mubr.f32.gmra.mrb[74].mxu1 %v4713_v1 }
 0x4c1   :  { %3158 = vmatpush1.bf16.msra.mxu1 %v5423_v44  ;;  %2552 = vmatprep.mubr.f32.mxu1 %v4718_v12 }
 0x4c2   :  { %3159 = vmatprep.subr.bf16.mxu1 %v5233_v8 }
 0x4c3   :  { %v1676_v31 = vpop.f32.mrb[2].mxu1 }
 0x4c4   :  { %2554 = vmatmul.mubr.f32.gmra.mrb[76].mxu1 %v4736_v17  ;;  %v1678_v14 = vpop.f32.mrb[3].mxu1 }
 0x4c5   :  { %3161 = vmatpush1.bf16.msra.mxu1 %v5424_v63  ;;  %2559 = vmatprep.mubr.f32.mxu1 %v4744_v48 }
 0x4c6   :  { %3162 = vmatprep.subr.bf16.mxu1 %v5233_v8 }
 0x4c7   :  { %v1691_v27 = vpop.f32.mrb[4].mxu1 }
 0x4c8   :  { %2561 = vmatmul.mubr.f32.gmra.mrb[78].mxu1 %v4754_v20  ;;  %v1693_v5 = vpop.f32.mrb[5].mxu1 }
 0x4c9   :  { %3164 = vmatpush1.bf16.msra.mxu1 %v5425_v42  ;;  %2655 = vmatprep.mubr.f32.mxu1 %v4387_v16 }
 0x4ca   :  { %3165 = vmatprep.subr.bf16.mxu1 %v5233_v8 }
 0x4cb   :  { %v1706_v7 = vpop.f32.mrb[6].mxu1 }
 0x4cc   :  { %v1708_v51 = vpop.f32.mrb[7].mxu1 }
 0x4cd   :  { %3167 = vmatpush1.bf16.msra.mxu1 %v5427_v6 }
 0x4ce   :  { %3168 = vmatprep.subr.bf16.mxu1 %v5233_v8 }
 0x4cf   :  { %v1721_v26 = vpop.f32.mrb[8].mxu1 }
 0x4d0   :  { %v1723_v4 = vpop.f32.mrb[9].mxu1 }
 0x4d1   :  { %3170 = vmatpush1.bf16.msra.mxu1 %v5428_v18 }
 0x4d2   :  { %3171 = vmatprep.subr.bf16.mxu1 %v5233_v8 }
 0x4d3   :  { %v1736_v57 = vpop.f32.mrb[10].mxu1 }
 0x4d4   :  { %v1738_v39 = vpop.f32.mrb[11].mxu1 }
 0x4d5   :  { %3173 = vmatpush1.bf16.msra.mxu1 %v5429_v2 }
 0x4d6   :  { %3174 = vmatprep.subr.bf16.mxu1 %v5233_v8  ;;  %v1507_v8 = vpop.permute.xlu0 %1506 }
 0x4d7   :  { %v1751_v16 = vpop.f32.mrb[12].mxu1 }
 0x4d8   :  { %v1753_v52 = vpop.f32.mrb[13].mxu1 }
 0x4d9   :  { %3176 = vmatpush1.bf16.msra.mxu1 %v5430_v61 }
 0x4da   :  { %v1519_v44 = vpop.permute.xlu0 %1518 }
 0x4db   :  { %v1766_v13 = vpop.f32.mrb[14].mxu1  ;;  %v1707_v59 = vadd.f32 %v1706_v7, %v1519_v44 }
 0x4dc   :  { %2657 = vmatmul.mubr.f32.vlgmr.msra.gmra.mrb[80].mxu1 %v4579_v11  ;;  %v1768_v50 = vpop.f32.mrb[15].mxu1  ;;  %v1662_v11 = vadd.f32 %v1661_v36, %v1507_v8 }
 0x4dd   :  { %2662 = vmatprep.mubr.f32.mxu1 %v4590_v24 }
 0x4de   :  { %v1527_v61 = vpop.permute.xlu0 %1526 }
 0x4df   :  { %v1737_v19 = vadd.f32 %v1736_v57, %v1527_v61 }
 0x4e0   :  { %2664 = vmatmul.mubr.f32.gmra.mrb[82].mxu1 %v4606_v35 }
 0x4e1   :  { %2669 = vmatprep.mubr.f32.mxu1 %v4612_v15  ;;  %v1677_v15 = vadd.f32 %v1676_v31, %v1511_v54 }
 0x4e2   :  { %v1535_v46 = vpop.permute.xlu0 %1534 }
 0x4e3   :  { %v1767_v3 = vadd.f32 %v1766_v13, %v1535_v46 }
 0x4e4   :  { %2671 = vmatmul.mubr.f32.gmra.mrb[84].mxu1 %v4615_v30  ;;  %v1515_v30 = vpop.permute.xlu1 %1514 }
 0x4e5   :  { %2676 = vmatprep.mubr.f32.mxu1 %v4617_v29 }
 0x4e8   :  { %2678 = vmatmul.mubr.f32.gmra.mrb[86].mxu1 %v4640_v28 }
 0x4e9   :  { %2683 = vmatprep.mubr.f32.mxu1 %v4653_v62 }
 0x4ec   :  { %2685 = vmatmul.mubr.f32.gmra.mrb[88].mxu1 %v4677_v56  ;;  %v1692_v56 = vadd.f32 %v1691_v27, %v1515_v30 }
 0x4ed   :  { %2690 = vmatprep.mubr.f32.mxu1 %v4685_v21 }
 0x4ef   :  { %v1958_v24 = vpop.f32.mrb[16].mxu1 }
 0x4f0   :  { %v1959_v53 = vadd.f32 %v1958_v24, %v1662_v11  ;;  %v1960_v35 = vpop.f32.mrb[17].mxu1  ;;  %2692 = vmatmul.mubr.f32.gmra.mrb[90].mxu1 %v4713_v1  ;;  %v1523_v1 = vpop.permute.xlu1 %1522 }
 0x4f1   :  { %2697 = vmatprep.mubr.f32.mxu1 %v4718_v12  ;;  %v1722_v2 = vadd.f32 %v1721_v26, %v1523_v1 }
 0x4f3   :  { %v1965_v29 = vpop.f32.mrb[18].mxu1 }
 0x4f4   :  { %v1966_v28 = vadd.f32 %v1965_v29, %v1677_v15  ;;  %2699 = vmatmul.mubr.f32.gmra.mrb[92].mxu1 %v4736_v17  ;;  %v1967_v62 = vpop.f32.mrb[19].mxu1  ;;  %v1531_v9 = vpop.permute.xlu1 %1530 }
 0x4f5   :  { %2704 = vmatprep.mubr.f32.mxu1 %v4744_v48  ;;  %v1752_v55 = vadd.f32 %v1751_v16, %v1531_v9 }
 0x4f7   :  { %v1972_v21 = vpop.f32.mrb[20].mxu1 }
 0x4f8   :  { %v1973_v63 = vadd.f32 %v1972_v21, %v1692_v56  ;;  %2706 = vmatmul.mubr.f32.gmra.mrb[94].mxu1 %v4754_v20  ;;  %v1974_v42 = vpop.f32.mrb[21].mxu1 }
 0x4fb   :  { %v1979_v6 = vpop.f32.mrb[22].mxu1 }
 0x4fc   :  { %v1980_v12 = vadd.f32 %v1979_v6, %v1707_v59  ;;  %v1981_v18 = vpop.f32.mrb[23].mxu1 }
 0x4ff   :  { %v1986_v49 = vpop.f32.mrb[24].mxu1 }
 0x500   :  { %v1987_v40 = vadd.f32 %v1986_v49, %v1722_v2  ;;  %v1988_v17 = vpop.f32.mrb[25].mxu1 }
 0x503   :  { %v1993_v48 = vpop.f32.mrb[26].mxu1 }
 0x504   :  { %v1994_v33 = vadd.f32 %v1993_v48, %v1737_v19  ;;  %v1995_v41 = vpop.f32.mrb[27].mxu1 }
 0x507   :  { %v2000_v22 = vpop.f32.mrb[28].mxu1 }
 0x508   :  { %v2001_v20 = vadd.f32 %v2000_v22, %v1752_v55  ;;  %v2002_v37 = vpop.f32.mrb[29].mxu1 }
 0x50b   :  { %v2007_v10 = vpop.f32.mrb[30].mxu1 }
 0x50c   :  { %v2008_v0 = vadd.f32 %v2007_v10, %v1767_v3  ;;  %v2009_v45 = vpop.f32.mrb[31].mxu1 }
 0x51f   :  { %v2129_v34 = vpop.f32.mrb[32].mxu1 }
 0x520   :  { %v2130_v23 = vadd.f32 %v2129_v34, %v1959_v53  ;;  %v2131_v60 = vpop.f32.mrb[33].mxu1 }
 0x523   :  { %v2138_v58 = vpop.f32.mrb[34].mxu1 }
 0x524   :  { %v2139_v32 = vadd.f32 %v2138_v58, %v1966_v28  ;;  %v2140_v25 = vpop.f32.mrb[35].mxu1 }
 0x527   :  { %v2147_v47 = vpop.f32.mrb[36].mxu1 }
 0x528   :  { %v2148_v38 = vadd.f32 %v2147_v47, %v1973_v63  ;;  %v2149_v36 = vpop.f32.mrb[37].mxu1 }
 0x52b   :  { %v2156_v43 = vpop.f32.mrb[38].mxu1 }
 0x52c   :  { %v2157_v31 = vadd.f32 %v2156_v43, %v1980_v12  ;;  %v2158_v14 = vpop.f32.mrb[39].mxu1 }
 0x52d   :  { %v3302_v14 = vld [vmem:[%s5065_s0] sm:$0xff] }
 0x52f   :  { %v2165_v27 = vpop.f32.mrb[40].mxu1 }
 0x530   :  { %v2166_v5 = vadd.f32 %v2165_v27, %v1987_v40  ;;  %v2167_v7 = vpop.f32.mrb[41].mxu1 }
 0x533   :  { %v2174_v51 = vpop.f32.mrb[42].mxu1 }
 0x534   :  { %v2175_v26 = vadd.f32 %v2174_v51, %v1994_v33  ;;  %v2176_v4 = vpop.f32.mrb[43].mxu1 }
 0x537   :  { %v2183_v57 = vpop.f32.mrb[44].mxu1 }
 0x538   :  { %v2184_v39 = vadd.f32 %v2183_v57, %v2001_v20  ;;  %v2185_v16 = vpop.f32.mrb[45].mxu1 }
 0x53b   :  { %v2192_v52 = vpop.f32.mrb[46].mxu1 }
 0x53c   :  { %v2193_v13 = vadd.f32 %v2192_v52, %v2008_v0  ;;  %v2194_v50 = vpop.f32.mrb[47].mxu1  ;;  %v3304_v52 = vld [vmem:[%s5065_s0 + $0x10] sm:$0xff] }
 0x54f   :  { %v2292_v8 = vpop.f32.mrb[48].mxu1 }
 0x550   :  { %v2293_v54 = vadd.f32 %v2292_v8, %v2130_v23  ;;  %v2294_v11 = vpop.f32.mrb[49].mxu1 }
 0x551   :  { %v3305_v11 = vld [vmem:[%s5065_s0 + $0x18] sm:$0xff] }
 0x553   :  { %v2303_v24 = vpop.f32.mrb[50].mxu1 }
 0x554   :  { %v2304_v53 = vadd.f32 %v2303_v24, %v2139_v32  ;;  %v2305_v35 = vpop.f32.mrb[51].mxu1 }
 0x557   :  { %v2314_v15 = vpop.f32.mrb[52].mxu1 }
 0x558   :  { %v2315_v30 = vadd.f32 %v2314_v15, %v2148_v38  ;;  %v2316_v29 = vpop.f32.mrb[53].mxu1 }
 0x55b   :  { %v2325_v28 = vpop.f32.mrb[54].mxu1 }
 0x55c   :  { %v2326_v62 = vadd.f32 %v2325_v28, %v2157_v31  ;;  %v2327_v56 = vpop.f32.mrb[55].mxu1 }
 0x55f   :  { %v2336_v44 = vpop.f32.mrb[56].mxu1 }
 0x560   :  { %v2337_v21 = vadd.f32 %v2336_v44, %v2166_v5  ;;  %v2338_v63 = vpop.f32.mrb[57].mxu1  ;;  %v3307_v44 = vld [vmem:[%s5065_s0 + $0x28] sm:$0xff] }
 0x563   :  { %v2347_v42 = vpop.f32.mrb[58].mxu1 }
 0x564   :  { %v2348_v59 = vadd.f32 %v2347_v42, %v2175_v26  ;;  %v2349_v1 = vpop.f32.mrb[59].mxu1  ;;  %v3303_v26 = vld [vmem:[%s5065_s0 + $0x8] sm:$0xff] }
 0x565   :  { %v3308_v1 = vld [vmem:[%s5065_s0 + $0x30] sm:$0xff] }
 0x567   :  { %v2358_v6 = vpop.f32.mrb[60].mxu1 }
 0x568   :  { %v2359_v12 = vadd.f32 %v2358_v6, %v2184_v39  ;;  %v2360_v18 = vpop.f32.mrb[61].mxu1 }
 0x56b   :  { %v2369_v2 = vpop.f32.mrb[62].mxu1 }
 0x56c   :  { %v2370_v61 = vadd.f32 %v2369_v2, %v2193_v13  ;;  %v2371_v49 = vpop.f32.mrb[63].mxu1 }
 0x57f   :  { %v2513_v40 = vpop.f32.mrb[64].mxu1 }
 0x580   :  { %v2514_v17 = vadd.f32 %v2513_v40, %v2293_v54  ;;  %v2515_v19 = vpop.f32.mrb[65].mxu1 }
 0x583   :  { %v2520_v9 = vpop.f32.mrb[66].mxu1 }
 0x584   :  { %v2521_v48 = vadd.f32 %v2520_v9, %v2304_v53  ;;  %v2522_v33 = vpop.f32.mrb[67].mxu1 }
 0x587   :  { %v2527_v41 = vpop.f32.mrb[68].mxu1 }
 0x588   :  { %v2528_v55 = vadd.f32 %v2527_v41, %v2315_v30  ;;  %v2529_v46 = vpop.f32.mrb[69].mxu1  ;;  %v3306_v30 = vld [vmem:[%s5065_s0 + $0x20] sm:$0xff] }
 0x58b   :  { %v2534_v22 = vpop.f32.mrb[70].mxu1 }
 0x58c   :  { %v2535_v20 = vadd.f32 %v2534_v22, %v2326_v62  ;;  %v2536_v37 = vpop.f32.mrb[71].mxu1 }
 0x58f   :  { %v2541_v3 = vpop.f32.mrb[72].mxu1 }
 0x590   :  { %v2542_v10 = vadd.f32 %v2541_v3, %v2337_v21  ;;  %v2543_v0 = vpop.f32.mrb[73].mxu1 }
 0x593   :  { %v2548_v45 = vpop.f32.mrb[74].mxu1 }
 0x594   :  { %v2549_v34 = vadd.f32 %v2548_v45, %v2348_v59  ;;  %v2550_v23 = vpop.f32.mrb[75].mxu1 }
 0x597   :  { %v2555_v60 = vpop.f32.mrb[76].mxu1 }
 0x598   :  { %v2556_v58 = vadd.f32 %v2555_v60, %v2359_v12  ;;  %v2557_v32 = vpop.f32.mrb[77].mxu1 }
 0x59b   :  { %v2562_v25 = vpop.f32.mrb[78].mxu1 }
 0x59c   :  { %v2563_v47 = vadd.f32 %v2562_v25, %v2370_v61  ;;  %v2564_v38 = vpop.f32.mrb[79].mxu1  ;;  %v3309_v61 = vld [vmem:[%s5065_s0 + $0x38] sm:$0xff] }
 0x5af   :  { %v2658_v36 = vpop.f32.mrb[80].mxu1 }
 0x5b0   :  { %v2659_v43 = vadd.f32 %v2658_v36, %v2514_v17  ;;  %v2660_v31 = vpop.f32.mrb[81].mxu1 }
 0x5b2   :  { %v2711_v27 = vadd.f32 %v3302_v14, %v2659_v43 }
 0x5b3   :  { %v2665_v5 = vpop.f32.mrb[82].mxu1 }
 0x5b4   :  { %2719 = vst [vmem:[#allocation7] sm:$0xff] %v2711_v27  ;;  %v2666_v7 = vadd.f32 %v2665_v5, %v2521_v48  ;;  %v2667_v51 = vpop.f32.mrb[83].mxu1 }
 0x5b6   :  { %v2712_v4 = vadd.f32 %v3303_v26, %v2666_v7 }
 0x5b7   :  { %v2672_v57 = vpop.f32.mrb[84].mxu1 }
 0x5b8   :  { %2720 = vst [vmem:[#allocation7 + $0x8] sm:$0xff] %v2712_v4  ;;  %v2673_v39 = vadd.f32 %v2672_v57, %v2528_v55  ;;  %v2674_v16 = vpop.f32.mrb[85].mxu1 }
 0x5ba   :  { %v2713_v13 = vadd.f32 %v3304_v52, %v2673_v39 }
 0x5bb   :  { %v2679_v50 = vpop.f32.mrb[86].mxu1 }
 0x5bc   :  { %2721 = vst [vmem:[#allocation7 + $0x10] sm:$0xff] %v2713_v13  ;;  %v2680_v8 = vadd.f32 %v2679_v50, %v2535_v20  ;;  %v2681_v54 = vpop.f32.mrb[87].mxu1 }
 0x5be   :  { %v2714_v24 = vadd.f32 %v3305_v11, %v2680_v8 }
 0x5bf   :  { %v2686_v53 = vpop.f32.mrb[88].mxu1 }
 0x5c0   :  { %2722 = vst [vmem:[#allocation7 + $0x18] sm:$0xff] %v2714_v24  ;;  %v2687_v35 = vadd.f32 %v2686_v53, %v2542_v10  ;;  %v2688_v15 = vpop.f32.mrb[89].mxu1 }
 0x5c2   :  { %v2715_v29 = vadd.f32 %v3306_v30, %v2687_v35 }
 0x5c3   :  { %v2693_v28 = vpop.f32.mrb[90].mxu1 }
 0x5c4   :  { %2723 = vst [vmem:[#allocation7 + $0x20] sm:$0xff] %v2715_v29  ;;  %v2694_v62 = vadd.f32 %v2693_v28, %v2549_v34  ;;  %v2695_v56 = vpop.f32.mrb[91].mxu1 }
 0x5c6   :  { %v2716_v21 = vadd.f32 %v3307_v44, %v2694_v62 }
 0x5c7   :  { %v2700_v63 = vpop.f32.mrb[92].mxu1 }
 0x5c8   :  { %2724 = vst [vmem:[#allocation7 + $0x28] sm:$0xff] %v2716_v21  ;;  %v2701_v42 = vadd.f32 %v2700_v63, %v2556_v58  ;;  %v2702_v59 = vpop.f32.mrb[93].mxu1 }
 0x5ca   :  { %v2717_v6 = vadd.f32 %v3308_v1, %v2701_v42 }
 0x5cb   :  { %v2707_v12 = vpop.f32.mrb[94].mxu1 }
 0x5cc   :  { %2725 = vst [vmem:[#allocation7 + $0x30] sm:$0xff] %v2717_v6  ;;  %v2708_v18 = vadd.f32 %v2707_v12, %v2563_v47  ;;  %v2709_v2 = vpop.f32.mrb[95].mxu1 }
 0x5ce   :  { %v2718_v49 = vadd.f32 %v3309_v61, %v2708_v18 }
 0x5d0   :  { %2726 = vst [vmem:[#allocation7 + $0x38] sm:$0xff] %v2718_v49 }
 0x5d1   :  { %3365 = shalt.err (!%p3362_p6)
}
 0x5d2   :  { %s3366_s27 = scalar_lea.hbm %s5069_s4, 1024 }
 0x5d3   :  { %p3367_p7 = scmp.ne.s32.totalorder %s5069_s4, %s3366_s27  ;;  %p3370_p8 = scmp.lt.u32.totalorder %s3366_s27, %s5069_s4 }
 0x5d5   :  { %p3372_p9 = pnand %p3370_p8, %p3367_p7 }
 0x5d7   :  { %3375 = shalt.err (!%p3372_p9)
}
 0x5d8   :  { %s3394_s6 = smov 128   ;;  %s3395_s7 = smov 8  }
 0x5d9   :  { %2738 = dma.vmem_to_hbm [thread:$0]  %s2733_s21, 1024, %s5069_s4, [#allocation4], %s3394_s6, %s3394_s6, %s3395_s7  }
 0x5da   :  { %3380 = dma.done.wait [#allocation4], 1024  }
 0x5db   :  { %3381 = vsyncadd [#allocation4], 4294966272 }
 0x5dc   :  { %2742 = vsyncpa [#allocation3], 1 }
 0x5dd   :  { %2743 = vsyncpa [#allocation6], 1 }
 0x5de   :  { %2744 = vsyncpa [#allocation4], 1 }

</bundles_post_ra>
